<compile_context>
chip_gen: v7x
topology: tpu7x:2x2x1
jax: 0.10.0
libtpu: 0.0.40
codegen_flags: <defaults>
</compile_context>

<pallas_src>
import functools

import jax
import jax.numpy as jnp
from jax import lax
from jax.experimental import pallas as pl
from jax.experimental.pallas import tpu as pltpu

INPUT_DIM = 2304
HIDDEN = 64


def _round_up(x, m):
    return (x + m - 1) // m * m


def _largest_divisor_leq(n, cap):
    for d in range(min(n, cap), 0, -1):
        if n % d == 0:
            return d
    return 1


# ---------------------------------------------------------------------------
# Kernel 1: batched input projection  gates_x = x @ W_ih^T + (b_ih + b_hh)
# ---------------------------------------------------------------------------
def _proj_kernel(x_ref, w_ref, b_ref, out_ref):
    out_ref[...] = (
        jnp.dot(x_ref[...], w_ref[...], preferred_element_type=jnp.float32)
        + b_ref[...]
    )


# ---------------------------------------------------------------------------
# Kernel 2: LSTM recurrence over precomputed gate pre-activations + final fc
# ---------------------------------------------------------------------------
def _lstm_chunk_kernel(gx_ref, whh_ref, wfc_ref, bfc_ref, out_ref, h_ref, c_ref,
                       *, chunk, hidden):
    H = hidden
    c_idx = pl.program_id(0)

    @pl.when(c_idx == 0)
    def _init():
        h_ref[...] = jnp.zeros_like(h_ref)
        c_ref[...] = jnp.zeros_like(c_ref)

    def step(t, carry):
        h, c = carry
        # (B, 4H): hoisted x-projection (+ fused bias) + recurrent projection.
        gates = gx_ref[t] + jnp.dot(h, whh_ref[...],
                                    preferred_element_type=jnp.float32)
        # PyTorch gate order i|f|g|o.  i|f fill the first 128-lane half, g|o the
        # second: activate each half as a whole vreg (lane-mask blend on g|o).
        if_act = jax.nn.sigmoid(gates[:, : 2 * H])
        go_pre = gates[:, 2 * H:]
        lane = lax.broadcasted_iota(jnp.int32, go_pre.shape, 1)
        go_act = jnp.where(lane < H, jnp.tanh(go_pre), jax.nn.sigmoid(go_pre))
        i_g = if_act[:, :H]
        f_g = if_act[:, H:]
        g_g = go_act[:, :H]
        o_g = go_act[:, H:]
        c_new = f_g * c + i_g * g_g
        h_new = o_g * jnp.tanh(c_new)
        return h_new, c_new

    h, c = lax.fori_loop(0, chunk, step, (h_ref[...], c_ref[...]), unroll=True)
    h_ref[...] = h
    c_ref[...] = c

    @pl.when(c_idx == pl.num_programs(0) - 1)
    def _finalize():
        # fc(h_T): broadcast-multiply + lane reduce on the VPU/XLU (no N=1 MXU matmul).
        out_ref[...] = (jnp.sum(h * wfc_ref[...], axis=-1, keepdims=True)
                        + bfc_ref[...])


def rnn_forward(x, w_ih, w_hh, b_ih, b_hh, w_fc, b_fc, mxu_dtype=jnp.bfloat16):
    """x: (B, T, 2304) float32.  Weights in PyTorch shapes:
       w_ih (4H, 2304), w_hh (4H, H), b_ih (4H,), b_hh (4H,), w_fc (1, H), b_fc (1,).
       mxu_dtype: dtype of the hoisted projection's MXU operands (bf16 for v6e/v7x;
       pass jnp.float32 for a tight-tolerance path).  Returns (B, 1) f32."""
    B, T, D = x.shape
    H = HIDDEN
    G = 4 * H
    assert D == INPUT_DIM

    # ---- 1. hoisted input projection over all B*T rows (batch_first; no x transpose) ----
    M = B * T
    tm = 128 if M >= 128 else _round_up(M, 8)
    Mp = _round_up(M, tm)

    x2d = x.reshape(M, D).astype(mxu_dtype)
    if Mp != M:
        x2d = jnp.pad(x2d, ((0, Mp - M), (0, 0)))
    wih_t = jnp.transpose(w_ih).astype(mxu_dtype)                  # (D, 4H)
    bias = (b_ih + b_hh).reshape(1, G).astype(jnp.float32)         # (1, 4H) fused bias

    gates2d = pl.pallas_call(
        _proj_kernel,
        out_shape=jax.ShapeDtypeStruct((Mp, G), jnp.float32),
        grid=(Mp // tm,),
        in_specs=[
            pl.BlockSpec((tm, D), lambda i: (i, 0)),               # x rows (pipelined)
            pl.BlockSpec(memory_space=pltpu.MemorySpace.VMEM),     # W_ih^T resident
            pl.BlockSpec(memory_space=pltpu.MemorySpace.VMEM),     # fused bias resident
        ],
        out_specs=pl.BlockSpec((tm, G), lambda i: (i, 0)),
        compiler_params=pltpu.CompilerParams(
            dimension_semantics=("parallel",)),
    )(x2d, wih_t, bias)

    # Only the small (B*T, 4H) result is reordered to time-major for the recurrence.
    gates_tbg = gates2d[:M].reshape(B, T, G).transpose(1, 0, 2)    # (T, B, 4H)

    # ---- 2. sequential LSTM recurrence, chunked over time ----
    Tc = _largest_divisor_leq(T, 16)   # amortize ~0.35us/grid-step over Tc timesteps

    whh_t = jnp.transpose(w_hh).astype(jnp.float32)                # (H, 4H)
    wfc = w_fc.reshape(1, H).astype(jnp.float32)                   # (1, H)
    bfc = b_fc.reshape(1, 1).astype(jnp.float32)                   # (1, 1)

    kernel = functools.partial(_lstm_chunk_kernel, chunk=Tc, hidden=H)

    return pl.pallas_call(
        kernel,
        out_shape=jax.ShapeDtypeStruct((B, 1), jnp.float32),
        grid_spec=pltpu.PrefetchScalarGridSpec(
            num_scalar_prefetch=0,
            grid=(T // Tc,),
            in_specs=[
                pl.BlockSpec((Tc, B, G), lambda c: (c, 0, 0)),      # gate pre-acts (pipelined)
                pl.BlockSpec(memory_space=pltpu.MemorySpace.VMEM),  # W_hh^T resident
                pl.BlockSpec(memory_space=pltpu.MemorySpace.VMEM),  # fc weight resident
                pl.BlockSpec(memory_space=pltpu.MemorySpace.VMEM),  # fc bias resident
            ],
            out_specs=pl.BlockSpec((B, 1), lambda c: (0, 0)),
            scratch_shapes=[
                pltpu.VMEM((B, H), jnp.float32),   # h carried across chunks
                pltpu.VMEM((B, H), jnp.float32),   # c carried across chunks
            ],
        ),
        compiler_params=pltpu.CompilerParams(
            dimension_semantics=("arbitrary",)),   # time is inherently sequential
    )(gates_tbg, whh_t, wfc, bfc)


def rnn_reference(x, w_ih, w_hh, b_ih, b_hh, w_fc, b_fc):
    """Pure-JAX f32 reference matching torch.nn.LSTM + Linear semantics."""
    B, T, D = x.shape
    H = HIDDEN

    def step(carry, x_t):
        h, c = carry
        gates = x_t @ w_ih.T + b_ih + h @ w_hh.T + b_hh
        i = jax.nn.sigmoid(gates[:, 0 * H:1 * H])
        f = jax.nn.sigmoid(gates[:, 1 * H:2 * H])
        g = jnp.tanh(gates[:, 2 * H:3 * H])
        o = jax.nn.sigmoid(gates[:, 3 * H:4 * H])
        c = f * c + i * g
        h = o * jnp.tanh(c)
        return (h, c), None

    h0 = jnp.zeros((B, H), jnp.float32)
    c0 = jnp.zeros((B, H), jnp.float32)
    (h_last, _), _ = jax.lax.scan(step, (h0, c0), jnp.transpose(x, (1, 0, 2)))
    return h_last @ w_fc.T + b_fc


if __name__ == "__main__":
    key = jax.random.PRNGKey(0)
    B, T, D, H = 2, 8, INPUT_DIM, HIDDEN

    ks = jax.random.split(key, 8)
    x = jax.random.normal(ks[0], (B, T, D), jnp.float32)

    scale = 0.05
    w_ih = scale * jax.random.normal(ks[1], (4 * H, D), jnp.float32)
    w_hh = scale * jax.random.normal(ks[2], (4 * H, H), jnp.float32)
    b_ih = scale * jax.random.normal(ks[3], (4 * H,), jnp.float32)
    b_hh = scale * jax.random.normal(ks[4], (4 * H,), jnp.float32)
    w_fc = scale * jax.random.normal(ks[5], (1, H), jnp.float32)
    b_fc = scale * jax.random.normal(ks[6], (1,), jnp.float32)

    ref = rnn_reference(x, w_ih, w_hh, b_ih, b_hh, w_fc, b_fc)

    # f32 MXU path: tight tolerance check of kernel structure.
    out_f32 = jax.block_until_ready(
        rnn_forward(x, w_ih, w_hh, b_ih, b_hh, w_fc, b_fc, mxu_dtype=jnp.float32))
    assert out_f32.shape == (B, 1), out_f32.shape
    assert jnp.allclose(out_f32, ref, atol=2e-4, rtol=2e-4), (out_f32, ref)

    # Default bf16 MXU path (perf default for v6e/v7x): looser tolerance vs the f32
    # reference to absorb bf16 quantization of the K=2304 projection.
    out_bf16 = jax.block_until_ready(
        rnn_forward(x, w_ih, w_hh, b_ih, b_hh, w_fc, b_fc, mxu_dtype=jnp.bfloat16))
    assert out_bf16.shape == (B, 1), out_bf16.shape
    assert jnp.allclose(out_bf16, ref, atol=5e-2, rtol=5e-2), (out_bf16, ref)

    print("KERNEL_OK")
</pallas_src>

<mosaic_0001>
module attributes {stable_mosaic.version = 11 : i64} {
  func.func @_proj_kernel(%arg0: i32, %arg1: memref<16x2304xf32, #tpu.memory_space<vmem>>, %arg2: memref<2304x256xf32, #tpu.memory_space<vmem>>, %arg3: memref<1x256xf32, #tpu.memory_space<vmem>>, %arg4: memref<16x256xf32, #tpu.memory_space<vmem>>) attributes {dimension_semantics = [#tpu.dimension_semantics<parallel>], iteration_bounds = array<i64: 1>, scalar_prefetch = 0 : i64, scratch_operands = 0 : i64, tpu.core_type = #tpu.core_type<tc>, window_params = [{transform_indices = @transform_0, window_bounds = array<i64: 16, 2304>}, {pipeline_mode = #tpu.pipeline_mode<synchronous>, transform_indices = @transform_1, window_bounds = array<i64: 2304, 256>}, {pipeline_mode = #tpu.pipeline_mode<synchronous>, transform_indices = @transform_2, window_bounds = array<i64: 1, 256>}, {transform_indices = @transform_3, window_bounds = array<i64: 16, 256>}]} {
    %c0 = arith.constant 0 : index
    %c0_0 = arith.constant 0 : index
    %0 = vector.load %arg1[%c0, %c0_0] : memref<16x2304xf32, #tpu.memory_space<vmem>>, vector<16x2304xf32>
    %c0_1 = arith.constant 0 : index
    %c0_2 = arith.constant 0 : index
    %1 = vector.load %arg2[%c0_1, %c0_2] : memref<2304x256xf32, #tpu.memory_space<vmem>>, vector<2304x256xf32>
    %cst = arith.constant dense<0.000000e+00> : vector<16x256xf32>
    %2 = tpu.matmul %0, %1, %cst {dimension_numbers = #tpu.dot_dimension_numbers<[1], [0], [0], [1], [0, 0, 1, 1], [], []>} : vector<16x2304xf32>, vector<2304x256xf32>, vector<16x256xf32> -> vector<16x256xf32>
    %c0_3 = arith.constant 0 : index
    %c0_4 = arith.constant 0 : index
    %3 = vector.load %arg3[%c0_3, %c0_4] : memref<1x256xf32, #tpu.memory_space<vmem>>, vector<1x256xf32>
    %4 = vector.broadcast %3 : vector<1x256xf32> to vector<16x256xf32>
    %5 = arith.addf %2, %4 : vector<16x256xf32>
    %c0_5 = arith.constant 0 : index
    %c0_6 = arith.constant 0 : index
    %6 = vector.load %arg4[%c0_5, %c0_6] : memref<16x256xf32, #tpu.memory_space<vmem>>, vector<16x256xf32>
    tpu.vector_store %arg4[%c0_5, %c0_6], %5 {strides = array<i32>} : memref<16x256xf32, #tpu.memory_space<vmem>>, vector<16x256xf32>,
    return
  }
  func.func @transform_0(%arg0: i32) -> (i32, i32) {
    %c0_i32 = arith.constant 0 : i32
    %c0_i32_0 = arith.constant 0 : i32
    return %arg0, %c0_i32 : i32, i32
  }
  func.func @transform_1(%arg0: i32) -> (i32, i32) {
    %c0_i32 = arith.constant 0 : i32
    %c0_i32_0 = arith.constant 0 : i32
    %c0_i32_1 = arith.constant 0 : i32
    return %c0_i32, %c0_i32_0 : i32, i32
  }
  func.func @transform_2(%arg0: i32) -> (i32, i32) {
    %c0_i32 = arith.constant 0 : i32
    %c0_i32_0 = arith.constant 0 : i32
    %c0_i32_1 = arith.constant 0 : i32
    return %c0_i32, %c0_i32_0 : i32, i32
  }
  func.func @transform_3(%arg0: i32) -> (i32, i32) {
    %c0_i32 = arith.constant 0 : i32
    %c0_i32_0 = arith.constant 0 : i32
    return %arg0, %c0_i32 : i32, i32
  }
}

</mosaic_0001>

<bundles_post_ra>
// kernel: tpu_custom_call.1
= control target key start
LH: loop header
LB: loop body
LE: loop exit
PB: predicated region body
PF: predicated region fallthrough
CT: control target
= control target key end

     0   :  { %8 = vsyncpa [#allocation3], 0  ;;  %s2221_s0 = inlined_call_operand.hbm [shape: f32[16,2304], index: 0, kind: input, shape index: {}]   ;;  %s2222_s1 = inlined_call_operand.hbm [shape: f32[2304,256], index: 1, kind: input, shape index: {}]   ;;  %s2223_s2 = inlined_call_operand.hbm [shape: f32[1,256], index: 2, kind: input, shape index: {}]   ;;  %s2224_s3 = inlined_call_operand.hbm [shape: f32[16,256], index: 3, kind: output, shape index: {}]  }
   0x1   :  { %9 = vsyncpa [#allocation6], 0 }
   0x2   :  { %10 = vsyncpa [#allocation4], 0  ;;  %s2139_s12 = smov [#allocation5]   ;;  %s2045_s16 = scalar_lea.hbm %s2222_s1, 73728 }
   0x3   :  { %s28_s13 = sshll.u32 %s2139_s12, 4  ;;  %p2046_p0 = scmp.ne.s32.totalorder %s2222_s1, %s2045_s16  ;;  %s29_s13 = int_to_ptr.vmem [resolvable:$true] %s28_s13 }
   0x4   :  { %p2049_p1 = scmp.lt.u32.totalorder %s2045_s16, %s2222_s1 }
   0x6   :  { %p2051_p2 = pnand %p2049_p1, %p2046_p0 }
   0x8   :  { %2054 = shalt.err (!%p2051_p2)
}
   0x9   :  { %s2055_s21 = scalar_lea.vmem %s29_s13, 73728  ;;  %p2060_p4 = scmp.lt.s32.totalorder %s29_s13, %s29_s13 }
   0xa   :  { %p2056_p3 = scmp.ne.s32.totalorder %s29_s13, %s2055_s21  ;;  %p2061_p5 = scmp.lt.s32.totalorder %s2055_s21, %s2055_s21 }
   0xc   :  { %p2062_p6 = por %p2061_p5, %p2060_p4 }
   0xe   :  { %p2063_p7 = pnand %p2062_p6, %p2056_p3 }
  0x10   :  { %2066 = shalt.err (!%p2063_p7)
}
  0x11   :  { %s2140_s22 = smov 256   ;;  %s2141_s23 = smov 16  }
  0x12   :  { %34 = dma.hbm_to_vmem [thread:$0]  %s2222_s1, 73728, %s29_s13, [#allocation6], %s2140_s22, %s2140_s22, %s2141_s23  }
  0x13   :  { %s2142_s26 = smov [#allocation2]   ;;  %s2067_s30 = scalar_lea.hbm %s2221_s0, 4608 }
  0x14   :  { %s16_s27 = sshll.u32 %s2142_s26, 4  ;;  %p2068_p8 = scmp.ne.s32.totalorder %s2221_s0, %s2067_s30  ;;  %s17_s27 = int_to_ptr.vmem [resolvable:$true] %s16_s27 }
  0x15   :  { %p2071_p9 = scmp.lt.u32.totalorder %s2067_s30, %s2221_s0 }
  0x17   :  { %p2073_p10 = pnand %p2071_p9, %p2068_p8 }
  0x19   :  { %2076 = shalt.err (!%p2073_p10)
}
  0x1a   :  { %s2077_s8 = scalar_lea.vmem %s17_s27, 4608  ;;  %p2082_p12 = scmp.lt.s32.totalorder %s17_s27, %s17_s27 }
  0x1b   :  { %p2078_p11 = scmp.ne.s32.totalorder %s17_s27, %s2077_s8  ;;  %p2083_p13 = scmp.lt.s32.totalorder %s2077_s8, %s2077_s8 }
  0x1d   :  { %p2084_p0 = por %p2083_p13, %p2082_p12 }
  0x1f   :  { %p2085_p1 = pnand %p2084_p0, %p2078_p11 }
  0x21   :  { %2088 = shalt.err (!%p2085_p1)
}
  0x22   :  { %s2143_s1 = smov 2304   ;;  %s2144_s9 = smov 144  }
  0x23   :  { %22 = dma.hbm_to_vmem [thread:$0]  %s2221_s0, 4608, %s17_s27, [#allocation3], %s2143_s1, %s2143_s1, %s2144_s9  }
  0x24   :  { %s2145_s12 = smov [#allocation7]   ;;  %s2089_s16 = scalar_lea.hbm %s2223_s2, 32 }
  0x25   :  { %s41_s13 = sshll.u32 %s2145_s12, 4  ;;  %p2090_p2 = scmp.ne.s32.totalorder %s2223_s2, %s2089_s16  ;;  %s42_s13 = int_to_ptr.vmem [resolvable:$true] %s41_s13 }
  0x26   :  { %p2093_p3 = scmp.lt.u32.totalorder %s2089_s16, %s2223_s2 }
  0x28   :  { %p2095_p4 = pnand %p2093_p3, %p2090_p2 }
  0x2a   :  { %2098 = shalt.err (!%p2095_p4)
}
  0x2b   :  { %s2099_s21 = scalar_lea.vmem %s42_s13, 32  ;;  %p2104_p6 = scmp.lt.s32.totalorder %s42_s13, %s42_s13 }
  0x2c   :  { %p2100_p5 = scmp.ne.s32.totalorder %s42_s13, %s2099_s21  ;;  %p2105_p7 = scmp.lt.s32.totalorder %s2099_s21, %s2099_s21 }
  0x2e   :  { %p2106_p8 = por %p2105_p7, %p2104_p6 }
  0x30   :  { %p2107_p9 = pnand %p2106_p8, %p2100_p5 }
  0x32   :  { %2110 = shalt.err (!%p2107_p9)
}
  0x33   :  { %44 = dma.hbm_to_vmem [thread:$0]  %s2223_s2, 32, %s42_s13, [#allocation6]  }
  0x34   :  { %2133 = dma.done.wait [#allocation3], 4608  }
  0x35   :  { %2134 = vsyncadd [#allocation3], 4294962688 }
  0x36   :  { %2135 = dma.done.wait [#allocation6], 73760  }
  0x37   :  { %2136 = vsyncadd [#allocation6], 4294893536  ;;  %v91_v0 = vld [vmem:[#allocation5 + $0x8] sm:$0xff]  ;;  %v93_v1 = vld [vmem:[#allocation5 + $0x18] sm:$0xff]  ;;  %s2146_s2 = smov [#allocation8]  }
  0x38   :  { %v347_v2 = vld [vmem:[#allocation5 + $0x808] sm:$0xff]  ;;  %v1393_v3 = vpack.c.bf16 %v93_v1, %v91_v0  ;;  %v349_v4 = vld [vmem:[#allocation5 + $0x818] sm:$0xff]  ;;  %v90_v5 = vld [vmem:[#allocation5] sm:$0xff]  ;;  %s1380_s25 = sshll.u32 %s2146_s2, 4  ;;  %s1381_s25 = int_to_ptr.vmem [resolvable:$true] %s1380_s25 }
  0x39   :  { %v92_v6 = vld [vmem:[#allocation5 + $0x10] sm:$0xff]  ;;  %v1649_v7 = vpack.c.bf16 %v349_v4, %v347_v2  ;;  %v346_v9 = vld [vmem:[#allocation5 + $0x800] sm:$0xff]  ;;  %v95_v11 = vld [vmem:[#allocation5 + $0x28] sm:$0xff]  ;;  %s2111_s26 = scalar_lea.vmem %s1381_s25, 512  ;;  %p2116_p11 = scmp.lt.s32.totalorder %s1381_s25, %s1381_s25 }
  0x3a   :  { %v1395_v8 = vpack.c.bf16 %v92_v6, %v90_v5  ;;  %v348_v10 = vld [vmem:[#allocation5 + $0x810] sm:$0xff]  ;;  %1394 = vmatprep.subr.bf16.mxu1 %v1393_v3  ;;  %v97_v13 = vld [vmem:[#allocation5 + $0x38] sm:$0xff]  ;;  %v351_v14 = vld [vmem:[#allocation5 + $0x828] sm:$0xff]  ;;  %p2112_p10 = scmp.ne.s32.totalorder %s1381_s25, %s2111_s26  ;;  %p2117_p12 = scmp.lt.s32.totalorder %s2111_s26, %s2111_s26 }
  0x3b   :  { %v1651_v12 = vpack.c.bf16 %v348_v10, %v346_v9  ;;  %v353_v15 = vld [vmem:[#allocation5 + $0x838] sm:$0xff]  ;;  %1650 = vmatprep.subr.bf16.mxu0 %v1649_v7  ;;  %v1397_v16 = vpack.c.bf16 %v97_v13, %v95_v11  ;;  %v94_v18 = vld [vmem:[#allocation5 + $0x20] sm:$0xff]  ;;  %v96_v19 = vld [vmem:[#allocation5 + $0x30] sm:$0xff] }
  0x3c   :  { %1396 = vmatpush1.bf16.msra.mxu1 %v1395_v8  ;;  %v1653_v17 = vpack.c.bf16 %v353_v15, %v351_v14  ;;  %v350_v20 = vld [vmem:[#allocation5 + $0x820] sm:$0xff]  ;;  %v1399_v21 = vpack.c.bf16 %v96_v19, %v94_v18  ;;  %v352_v22 = vld [vmem:[#allocation5 + $0x830] sm:$0xff]  ;;  %v99_v23 = vld [vmem:[#allocation5 + $0x48] sm:$0xff]  ;;  %p2118_p13 = por %p2117_p12, %p2116_p11 }
  0x3d   :  { %1652 = vmatpush1.bf16.msra.mxu0 %v1651_v12  ;;  %v101_v24 = vld [vmem:[#allocation5 + $0x58] sm:$0xff]  ;;  %1398 = vmatprep.subr.bf16.mxu1 %v1397_v16  ;;  %v1655_v25 = vpack.c.bf16 %v352_v22, %v350_v20  ;;  %v355_v27 = vld [vmem:[#allocation5 + $0x848] sm:$0xff]  ;;  %v98_v29 = vld [vmem:[#allocation5 + $0x40] sm:$0xff] }
  0x3e   :  { %1654 = vmatprep.subr.bf16.mxu0 %v1653_v17  ;;  %v1401_v26 = vpack.c.bf16 %v101_v24, %v99_v23  ;;  %v357_v28 = vld [vmem:[#allocation5 + $0x858] sm:$0xff]  ;;  %v100_v31 = vld [vmem:[#allocation5 + $0x50] sm:$0xff]  ;;  %v354_v32 = vld [vmem:[#allocation5 + $0x840] sm:$0xff]  ;;  %p2119_p0 = pnand %p2118_p13, %p2112_p10 }
  0x3f   :  { %v1657_v30 = vpack.c.bf16 %v357_v28, %v355_v27  ;;  %v356_v33 = vld [vmem:[#allocation5 + $0x850] sm:$0xff]  ;;  %v1403_v34 = vpack.c.bf16 %v100_v31, %v98_v29  ;;  %v103_v35 = vld [vmem:[#allocation5 + $0x68] sm:$0xff]  ;;  %v105_v36 = vld [vmem:[#allocation5 + $0x78] sm:$0xff] }
  0x40   :  { %1400 = vmatpush1.bf16.msra.mxu1 %v1399_v21  ;;  %v359_v37 = vld [vmem:[#allocation5 + $0x868] sm:$0xff]  ;;  %v1659_v38 = vpack.c.bf16 %v356_v33, %v354_v32  ;;  %v1405_v39 = vpack.c.bf16 %v105_v36, %v103_v35  ;;  %v361_v40 = vld [vmem:[#allocation5 + $0x878] sm:$0xff]  ;;  %v102_v41 = vld [vmem:[#allocation5 + $0x60] sm:$0xff] }
  0x41   :  { %1656 = vmatpush1.bf16.msra.mxu0 %v1655_v25  ;;  %1402 = vmatprep.subr.bf16.mxu1 %v1401_v26  ;;  %v104_v42 = vld [vmem:[#allocation5 + $0x70] sm:$0xff]  ;;  %v1661_v43 = vpack.c.bf16 %v361_v40, %v359_v37  ;;  %v358_v44 = vld [vmem:[#allocation5 + $0x860] sm:$0xff]  ;;  %v107_v46 = vld [vmem:[#allocation5 + $0x88] sm:$0xff] }
  0x42   :  { %1658 = vmatprep.subr.bf16.mxu0 %v1657_v30  ;;  %v360_v45 = vld [vmem:[#allocation5 + $0x870] sm:$0xff]  ;;  %v109_v47 = vld [vmem:[#allocation5 + $0x98] sm:$0xff]  ;;  %v363_v48 = vld [vmem:[#allocation5 + $0x888] sm:$0xff]  ;;  %v1407_v50 = vpack.c.bf16 %v104_v42, %v102_v41 }
  0x43   :  { %v365_v49 = vld [vmem:[#allocation5 + $0x898] sm:$0xff]  ;;  %v1663_v51 = vpack.c.bf16 %v360_v45, %v358_v44  ;;  %v1409_v52 = vpack.c.bf16 %v109_v47, %v107_v46  ;;  %v106_v53 = vld [vmem:[#allocation5 + $0x80] sm:$0xff]  ;;  %v108_v54 = vld [vmem:[#allocation5 + $0x90] sm:$0xff] }
  0x44   :  { %1404 = vmatpush1.bf16.msra.mxu1 %v1403_v34  ;;  %v362_v55 = vld [vmem:[#allocation5 + $0x880] sm:$0xff]  ;;  %v1665_v56 = vpack.c.bf16 %v365_v49, %v363_v48  ;;  %v364_v57 = vld [vmem:[#allocation5 + $0x890] sm:$0xff]  ;;  %v111_v58 = vld [vmem:[#allocation5 + $0xa8] sm:$0xff]  ;;  %v1411_v62 = vpack.c.bf16 %v108_v54, %v106_v53 }
  0x45   :  { %1660 = vmatpush1.bf16.msra.mxu0 %v1659_v38  ;;  %1406 = vmatprep.subr.bf16.mxu1 %v1405_v39  ;;  %v113_v59 = vld [vmem:[#allocation5 + $0xb8] sm:$0xff]  ;;  %v367_v60 = vld [vmem:[#allocation5 + $0x8a8] sm:$0xff]  ;;  %v1667_v63 = vpack.c.bf16 %v364_v57, %v362_v55  ;;  %v110_v1 = vld [vmem:[#allocation5 + $0xa0] sm:$0xff] }
  0x46   :  { %1662 = vmatprep.subr.bf16.mxu0 %v1661_v43  ;;  %v369_v61 = vld [vmem:[#allocation5 + $0x8b8] sm:$0xff]  ;;  %v1413_v0 = vpack.c.bf16 %v113_v59, %v111_v58  ;;  %v112_v2 = vld [vmem:[#allocation5 + $0xb0] sm:$0xff]  ;;  %v366_v3 = vld [vmem:[#allocation5 + $0x8a0] sm:$0xff] }
  0x47   :  { %v1669_v4 = vpack.c.bf16 %v369_v61, %v367_v60  ;;  %v368_v5 = vld [vmem:[#allocation5 + $0x8b0] sm:$0xff]  ;;  %v115_v6 = vld [vmem:[#allocation5 + $0xc8] sm:$0xff]  ;;  %v117_v7 = vld [vmem:[#allocation5 + $0xd8] sm:$0xff]  ;;  %v1415_v10 = vpack.c.bf16 %v112_v2, %v110_v1 }
  0x48   :  { %1408 = vmatpush1.bf16.msra.mxu1 %v1407_v50  ;;  %v371_v8 = vld [vmem:[#allocation5 + $0x8c8] sm:$0xff]  ;;  %v373_v9 = vld [vmem:[#allocation5 + $0x8d8] sm:$0xff]  ;;  %v1671_v11 = vpack.c.bf16 %v368_v5, %v366_v3  ;;  %v1417_v12 = vpack.c.bf16 %v117_v7, %v115_v6  ;;  %v114_v13 = vld [vmem:[#allocation5 + $0xc0] sm:$0xff] }
  0x49   :  { %1664 = vmatpush1.bf16.msra.mxu0 %v1663_v51  ;;  %1410 = vmatprep.subr.bf16.mxu1 %v1409_v52  ;;  %v116_v14 = vld [vmem:[#allocation5 + $0xd0] sm:$0xff]  ;;  %v370_v15 = vld [vmem:[#allocation5 + $0x8c0] sm:$0xff]  ;;  %v1673_v16 = vpack.c.bf16 %v373_v9, %v371_v8  ;;  %v119_v18 = vld [vmem:[#allocation5 + $0xe8] sm:$0xff] }
  0x4a   :  { %1666 = vmatprep.subr.bf16.mxu0 %v1665_v56  ;;  %v372_v17 = vld [vmem:[#allocation5 + $0x8d0] sm:$0xff]  ;;  %v121_v19 = vld [vmem:[#allocation5 + $0xf8] sm:$0xff]  ;;  %v375_v20 = vld [vmem:[#allocation5 + $0x8e8] sm:$0xff]  ;;  %v1419_v22 = vpack.c.bf16 %v116_v14, %v114_v13 }
  0x4b   :  { %v377_v21 = vld [vmem:[#allocation5 + $0x8f8] sm:$0xff]  ;;  %v1675_v23 = vpack.c.bf16 %v372_v17, %v370_v15  ;;  %v1421_v24 = vpack.c.bf16 %v121_v19, %v119_v18  ;;  %v118_v25 = vld [vmem:[#allocation5 + $0xe0] sm:$0xff]  ;;  %v120_v26 = vld [vmem:[#allocation5 + $0xf0] sm:$0xff] }
  0x4c   :  { %1412 = vmatpush1.bf16.msra.mxu1 %v1411_v62  ;;  %v374_v27 = vld [vmem:[#allocation5 + $0x8e0] sm:$0xff]  ;;  %v1677_v28 = vpack.c.bf16 %v377_v21, %v375_v20  ;;  %v376_v29 = vld [vmem:[#allocation5 + $0x8f0] sm:$0xff]  ;;  %v123_v30 = vld [vmem:[#allocation5 + $0x108] sm:$0xff]  ;;  %v1423_v34 = vpack.c.bf16 %v120_v26, %v118_v25 }
  0x4d   :  { %1668 = vmatpush1.bf16.msra.mxu0 %v1667_v63  ;;  %1414 = vmatprep.subr.bf16.mxu1 %v1413_v0  ;;  %v125_v31 = vld [vmem:[#allocation5 + $0x118] sm:$0xff]  ;;  %v379_v32 = vld [vmem:[#allocation5 + $0x908] sm:$0xff]  ;;  %v1679_v35 = vpack.c.bf16 %v376_v29, %v374_v27  ;;  %v122_v37 = vld [vmem:[#allocation5 + $0x100] sm:$0xff] }
  0x4e   :  { %1670 = vmatprep.subr.bf16.mxu0 %v1669_v4  ;;  %v381_v33 = vld [vmem:[#allocation5 + $0x918] sm:$0xff]  ;;  %v1425_v36 = vpack.c.bf16 %v125_v31, %v123_v30  ;;  %v124_v38 = vld [vmem:[#allocation5 + $0x110] sm:$0xff]  ;;  %v378_v39 = vld [vmem:[#allocation5 + $0x900] sm:$0xff] }
  0x4f   :  { %v1681_v40 = vpack.c.bf16 %v381_v33, %v379_v32  ;;  %v380_v41 = vld [vmem:[#allocation5 + $0x910] sm:$0xff]  ;;  %v127_v42 = vld [vmem:[#allocation5 + $0x128] sm:$0xff]  ;;  %v129_v43 = vld [vmem:[#allocation5 + $0x138] sm:$0xff]  ;;  %v1427_v46 = vpack.c.bf16 %v124_v38, %v122_v37 }
  0x50   :  { %1416 = vmatpush1.bf16.msra.mxu1 %v1415_v10  ;;  %v383_v44 = vld [vmem:[#allocation5 + $0x928] sm:$0xff]  ;;  %v385_v45 = vld [vmem:[#allocation5 + $0x938] sm:$0xff]  ;;  %v1683_v47 = vpack.c.bf16 %v380_v41, %v378_v39  ;;  %v1429_v48 = vpack.c.bf16 %v129_v43, %v127_v42  ;;  %v126_v49 = vld [vmem:[#allocation5 + $0x120] sm:$0xff] }
  0x51   :  { %1672 = vmatpush1.bf16.msra.mxu0 %v1671_v11  ;;  %1418 = vmatprep.subr.bf16.mxu1 %v1417_v12  ;;  %v128_v50 = vld [vmem:[#allocation5 + $0x130] sm:$0xff]  ;;  %v382_v51 = vld [vmem:[#allocation5 + $0x920] sm:$0xff]  ;;  %v1685_v52 = vpack.c.bf16 %v385_v45, %v383_v44  ;;  %v131_v54 = vld [vmem:[#allocation5 + $0x148] sm:$0xff] }
  0x52   :  { %1674 = vmatprep.subr.bf16.mxu0 %v1673_v16  ;;  %v384_v53 = vld [vmem:[#allocation5 + $0x930] sm:$0xff]  ;;  %v133_v55 = vld [vmem:[#allocation5 + $0x158] sm:$0xff]  ;;  %v387_v56 = vld [vmem:[#allocation5 + $0x948] sm:$0xff]  ;;  %v1431_v58 = vpack.c.bf16 %v128_v50, %v126_v49 }
  0x53   :  { %v389_v57 = vld [vmem:[#allocation5 + $0x958] sm:$0xff]  ;;  %v1687_v59 = vpack.c.bf16 %v384_v53, %v382_v51  ;;  %v1433_v60 = vpack.c.bf16 %v133_v55, %v131_v54  ;;  %v130_v61 = vld [vmem:[#allocation5 + $0x140] sm:$0xff]  ;;  %v132_v62 = vld [vmem:[#allocation5 + $0x150] sm:$0xff] }
  0x54   :  { %1420 = vmatpush1.bf16.msra.mxu1 %v1419_v22  ;;  %v386_v63 = vld [vmem:[#allocation5 + $0x940] sm:$0xff]  ;;  %v1689_v0 = vpack.c.bf16 %v389_v57, %v387_v56  ;;  %v388_v1 = vld [vmem:[#allocation5 + $0x950] sm:$0xff]  ;;  %v135_v2 = vld [vmem:[#allocation5 + $0x168] sm:$0xff]  ;;  %v1435_v6 = vpack.c.bf16 %v132_v62, %v130_v61 }
  0x55   :  { %1676 = vmatpush1.bf16.msra.mxu0 %v1675_v23  ;;  %1422 = vmatprep.subr.bf16.mxu1 %v1421_v24  ;;  %v137_v3 = vld [vmem:[#allocation5 + $0x178] sm:$0xff]  ;;  %v391_v4 = vld [vmem:[#allocation5 + $0x968] sm:$0xff]  ;;  %v134_v7 = vld [vmem:[#allocation5 + $0x160] sm:$0xff]  ;;  %v1691_v8 = vpack.c.bf16 %v388_v1, %v386_v63 }
  0x56   :  { %1678 = vmatprep.subr.bf16.mxu0 %v1677_v28  ;;  %v393_v5 = vld [vmem:[#allocation5 + $0x978] sm:$0xff]  ;;  %v1437_v9 = vpack.c.bf16 %v137_v3, %v135_v2  ;;  %v136_v10 = vld [vmem:[#allocation5 + $0x170] sm:$0xff]  ;;  %v390_v11 = vld [vmem:[#allocation5 + $0x960] sm:$0xff] }
  0x57   :  { %v392_v12 = vld [vmem:[#allocation5 + $0x970] sm:$0xff]  ;;  %v1693_v13 = vpack.c.bf16 %v393_v5, %v391_v4  ;;  %v139_v14 = vld [vmem:[#allocation5 + $0x188] sm:$0xff]  ;;  %v141_v15 = vld [vmem:[#allocation5 + $0x198] sm:$0xff]  ;;  %v1439_v20 = vpack.c.bf16 %v136_v10, %v134_v7 }
  0x58   :  { %1424 = vmatpush1.bf16.msra.mxu1 %v1423_v34  ;;  %v55_v16 = vld [vmem:[#allocation2 + $0x8] sm:$0xff]  ;;  %v397_v18 = vld [vmem:[#allocation5 + $0x998] sm:$0xff]  ;;  %v1695_v21 = vpack.c.bf16 %v392_v12, %v390_v11  ;;  %v1441_v22 = vpack.c.bf16 %v141_v15, %v139_v14  ;;  %v138_v23 = vld [vmem:[#allocation5 + $0x180] sm:$0xff] }
  0x59   :  { %1680 = vmatpush1.bf16.msra.mxu0 %v1679_v35  ;;  %1426 = vmatprep.subr.bf16.mxu1 %v1425_v36  ;;  %v395_v17 = vld [vmem:[#allocation5 + $0x988] sm:$0xff]  ;;  %v140_v24 = vld [vmem:[#allocation5 + $0x190] sm:$0xff]  ;;  %v394_v25 = vld [vmem:[#allocation5 + $0x980] sm:$0xff] }
  0x5a   :  { %1682 = vmatprep.subr.bf16.mxu0 %v1681_v40  ;;  %742 = vmatprep.mubr.f32.mxu1 %v55_v16  ;;  %v63_v19 = vld [vmem:[#allocation2 + $0x48] sm:$0xff]  ;;  %v1697_v26 = vpack.c.bf16 %v397_v18, %v395_v17  ;;  %v396_v27 = vld [vmem:[#allocation5 + $0x990] sm:$0xff]  ;;  %v145_v29 = vld [vmem:[#allocation5 + $0x1b8] sm:$0xff]  ;;  %v1443_v32 = vpack.c.bf16 %v140_v24, %v138_v23 }
  0x5b   :  { %1050 = vmatprep.mubr.f32.mxu0 %v63_v19  ;;  %v143_v28 = vld [vmem:[#allocation5 + $0x1a8] sm:$0xff]  ;;  %v401_v31 = vld [vmem:[#allocation5 + $0x9b8] sm:$0xff]  ;;  %v1699_v33 = vpack.c.bf16 %v396_v27, %v394_v25  ;;  %v142_v35 = vld [vmem:[#allocation5 + $0x1a0] sm:$0xff] }
  0x5c   :  { %1428 = vmatpush1.bf16.msra.mxu1 %v1427_v46  ;;  %v399_v30 = vld [vmem:[#allocation5 + $0x9a8] sm:$0xff]  ;;  %v1445_v34 = vpack.c.bf16 %v145_v29, %v143_v28  ;;  %v144_v36 = vld [vmem:[#allocation5 + $0x1b0] sm:$0xff]  ;;  %v398_v37 = vld [vmem:[#allocation5 + $0x9a0] sm:$0xff] }
  0x5d   :  { %1684 = vmatpush1.bf16.msra.mxu0 %v1683_v47  ;;  %1430 = vmatprep.subr.bf16.mxu1 %v1429_v48  ;;  %v1701_v38 = vpack.c.bf16 %v401_v31, %v399_v30  ;;  %v400_v39 = vld [vmem:[#allocation5 + $0x9b0] sm:$0xff]  ;;  %v147_v40 = vld [vmem:[#allocation5 + $0x1c8] sm:$0xff]  ;;  %v149_v41 = vld [vmem:[#allocation5 + $0x1d8] sm:$0xff]  ;;  %v1447_v44 = vpack.c.bf16 %v144_v36, %v142_v35 }
  0x5e   :  { %1686 = vmatprep.subr.bf16.mxu0 %v1685_v52  ;;  %v403_v42 = vld [vmem:[#allocation5 + $0x9c8] sm:$0xff]  ;;  %v405_v43 = vld [vmem:[#allocation5 + $0x9d8] sm:$0xff]  ;;  %v1703_v45 = vpack.c.bf16 %v400_v39, %v398_v37  ;;  %v1449_v46 = vpack.c.bf16 %v149_v41, %v147_v40  ;;  %v146_v47 = vld [vmem:[#allocation5 + $0x1c0] sm:$0xff] }
  0x5f   :  { %v148_v48 = vld [vmem:[#allocation5 + $0x1d0] sm:$0xff]  ;;  %v402_v49 = vld [vmem:[#allocation5 + $0x9c0] sm:$0xff]  ;;  %v1705_v50 = vpack.c.bf16 %v405_v43, %v403_v42  ;;  %v151_v52 = vld [vmem:[#allocation5 + $0x1e8] sm:$0xff] }
  0x60   :  { %1432 = vmatpush1.bf16.msra.mxu1 %v1431_v58  ;;  %v404_v51 = vld [vmem:[#allocation5 + $0x9d0] sm:$0xff]  ;;  %v153_v53 = vld [vmem:[#allocation5 + $0x1f8] sm:$0xff]  ;;  %v407_v54 = vld [vmem:[#allocation5 + $0x9e8] sm:$0xff]  ;;  %v1451_v56 = vpack.c.bf16 %v148_v48, %v146_v47 }
  0x61   :  { %1688 = vmatpush1.bf16.msra.mxu0 %v1687_v59  ;;  %1434 = vmatprep.subr.bf16.mxu1 %v1433_v60  ;;  %v409_v55 = vld [vmem:[#allocation5 + $0x9f8] sm:$0xff]  ;;  %v1707_v57 = vpack.c.bf16 %v404_v51, %v402_v49  ;;  %v1453_v58 = vpack.c.bf16 %v153_v53, %v151_v52  ;;  %v150_v59 = vld [vmem:[#allocation5 + $0x1e0] sm:$0xff]  ;;  %v152_v60 = vld [vmem:[#allocation5 + $0x1f0] sm:$0xff] }
  0x62   :  { %1690 = vmatprep.subr.bf16.mxu0 %v1689_v0  ;;  %v406_v61 = vld [vmem:[#allocation5 + $0x9e0] sm:$0xff]  ;;  %v1709_v62 = vpack.c.bf16 %v409_v55, %v407_v54  ;;  %v408_v63 = vld [vmem:[#allocation5 + $0x9f0] sm:$0xff]  ;;  %v155_v0 = vld [vmem:[#allocation5 + $0x208] sm:$0xff]  ;;  %v1455_v4 = vpack.c.bf16 %v152_v60, %v150_v59 }
  0x63   :  { %v157_v1 = vld [vmem:[#allocation5 + $0x218] sm:$0xff]  ;;  %v411_v2 = vld [vmem:[#allocation5 + $0xa08] sm:$0xff]  ;;  %v1711_v5 = vpack.c.bf16 %v408_v63, %v406_v61  ;;  %v154_v7 = vld [vmem:[#allocation5 + $0x200] sm:$0xff] }
  0x64   :  { %1436 = vmatpush1.bf16.msra.mxu1 %v1435_v6  ;;  %v413_v3 = vld [vmem:[#allocation5 + $0xa18] sm:$0xff]  ;;  %v1457_v6 = vpack.c.bf16 %v157_v1, %v155_v0  ;;  %v412_v11 = vld [vmem:[#allocation5 + $0xa10] sm:$0xff]  ;;  %v159_v12 = vld [vmem:[#allocation5 + $0x228] sm:$0xff] }
  0x65   :  { %1692 = vmatpush1.bf16.msra.mxu0 %v1691_v8  ;;  %1438 = vmatprep.subr.bf16.mxu1 %v1437_v9  ;;  %v156_v8 = vld [vmem:[#allocation5 + $0x210] sm:$0xff]  ;;  %v410_v9 = vld [vmem:[#allocation5 + $0xa00] sm:$0xff]  ;;  %v1713_v10 = vpack.c.bf16 %v413_v3, %v411_v2  ;;  %v415_v14 = vld [vmem:[#allocation5 + $0xa28] sm:$0xff] }
  0x66   :  { %1694 = vmatprep.subr.bf16.mxu0 %v1693_v13  ;;  %v161_v13 = vld [vmem:[#allocation5 + $0x238] sm:$0xff]  ;;  %v54_v16 = vld [vmem:[#allocation2] sm:$0xff]  ;;  %v1459_v17 = vpack.c.bf16 %v156_v8, %v154_v7  ;;  %v1715_v19 = vpack.c.bf16 %v412_v11, %v410_v9  ;;  %v416_v25 = vld [vmem:[#allocation5 + $0xa30] sm:$0xff] }
  0x67   :  { %v417_v15 = vld [vmem:[#allocation5 + $0xa38] sm:$0xff]  ;;  %v62_v18 = vld [vmem:[#allocation2 + $0x40] sm:$0xff]  ;;  %v419_v28 = vld [vmem:[#allocation5 + $0xa48] sm:$0xff] }
  0x68   :  { %1440 = vmatpush1.bf16.msra.mxu1 %v1439_v20  ;;  %v1461_v20 = vpack.c.bf16 %v161_v13, %v159_v12  ;;  %v414_v23 = vld [vmem:[#allocation5 + $0xa20] sm:$0xff]  ;;  %v1717_v24 = vpack.c.bf16 %v417_v15, %v415_v14  ;;  %v165_v27 = vld [vmem:[#allocation5 + $0x258] sm:$0xff]  ;;  %v420_v37 = vld [vmem:[#allocation5 + $0xa50] sm:$0xff] }
  0x69   :  { %1696 = vmatpush1.bf16.msra.mxu0 %v1695_v21  ;;  %1442 = vmatprep.subr.bf16.mxu1 %v1441_v22  ;;  %v158_v21 = vld [vmem:[#allocation5 + $0x220] sm:$0xff]  ;;  %v160_v22 = vld [vmem:[#allocation5 + $0x230] sm:$0xff]  ;;  %v421_v29 = vld [vmem:[#allocation5 + $0xa58] sm:$0xff]  ;;  %v1719_v31 = vpack.c.bf16 %v416_v25, %v414_v23 }
  0x6a   :  { %1698 = vmatprep.subr.bf16.mxu0 %v1697_v26  ;;  %v163_v26 = vld [vmem:[#allocation5 + $0x248] sm:$0xff]  ;;  %v1463_v30 = vpack.c.bf16 %v160_v22, %v158_v21  ;;  %v418_v35 = vld [vmem:[#allocation5 + $0xa40] sm:$0xff]  ;;  %v1721_v36 = vpack.c.bf16 %v421_v29, %v419_v28  ;;  %v169_v39 = vld [vmem:[#allocation5 + $0x278] sm:$0xff] }
  0x6b   :  { %v423_v40 = vld [vmem:[#allocation5 + $0xa68] sm:$0xff]  ;;  %v425_v41 = vld [vmem:[#allocation5 + $0xa78] sm:$0xff]  ;;  %v1723_v43 = vpack.c.bf16 %v420_v37, %v418_v35  ;;  %v422_v47 = vld [vmem:[#allocation5 + $0xa60] sm:$0xff] }
  0x6c   :  { %1444 = vmatpush1.bf16.msra.mxu1 %v1443_v32  ;;  %v1465_v32 = vpack.c.bf16 %v165_v27, %v163_v26  ;;  %v1725_v48 = vpack.c.bf16 %v425_v41, %v423_v40  ;;  %v424_v49 = vld [vmem:[#allocation5 + $0xa70] sm:$0xff]  ;;  %v173_v51 = vld [vmem:[#allocation5 + $0x298] sm:$0xff]  ;;  %v427_v52 = vld [vmem:[#allocation5 + $0xa88] sm:$0xff] }
  0x6d   :  { %1700 = vmatpush1.bf16.msra.mxu0 %v1699_v33  ;;  %1446 = vmatprep.subr.bf16.mxu1 %v1445_v34  ;;  %v162_v33 = vld [vmem:[#allocation5 + $0x240] sm:$0xff]  ;;  %v164_v34 = vld [vmem:[#allocation5 + $0x250] sm:$0xff]  ;;  %v429_v53 = vld [vmem:[#allocation5 + $0xa98] sm:$0xff]  ;;  %v1727_v55 = vpack.c.bf16 %v424_v49, %v422_v47 }
  0x6e   :  { %1702 = vmatprep.subr.bf16.mxu0 %v1701_v38  ;;  %v167_v38 = vld [vmem:[#allocation5 + $0x268] sm:$0xff]  ;;  %v1467_v42 = vpack.c.bf16 %v164_v34, %v162_v33  ;;  %v426_v59 = vld [vmem:[#allocation5 + $0xa80] sm:$0xff]  ;;  %v1729_v60 = vpack.c.bf16 %v429_v53, %v427_v52  ;;  %v428_v61 = vld [vmem:[#allocation5 + $0xa90] sm:$0xff] }
  0x6f   :  { %v177_v63 = vld [vmem:[#allocation5 + $0x2b8] sm:$0xff]  ;;  %v431_v0 = vld [vmem:[#allocation5 + $0xaa8] sm:$0xff]  ;;  %v1731_v3 = vpack.c.bf16 %v428_v61, %v426_v59  ;;  %v430_v7 = vld [vmem:[#allocation5 + $0xaa0] sm:$0xff] }
  0x70   :  { %1448 = vmatpush1.bf16.msra.mxu1 %v1447_v44  ;;  %v1469_v44 = vpack.c.bf16 %v169_v39, %v167_v38  ;;  %v433_v1 = vld [vmem:[#allocation5 + $0xab8] sm:$0xff]  ;;  %v432_v9 = vld [vmem:[#allocation5 + $0xab0] sm:$0xff]  ;;  %v435_v12 = vld [vmem:[#allocation5 + $0xac8] sm:$0xff] }
  0x71   :  { %1704 = vmatpush1.bf16.msra.mxu0 %v1703_v45  ;;  %1450 = vmatprep.subr.bf16.mxu1 %v1449_v46  ;;  %v166_v45 = vld [vmem:[#allocation5 + $0x260] sm:$0xff]  ;;  %v168_v46 = vld [vmem:[#allocation5 + $0x270] sm:$0xff]  ;;  %v1733_v8 = vpack.c.bf16 %v433_v1, %v431_v0  ;;  %v181_v11 = vld [vmem:[#allocation5 + $0x2d8] sm:$0xff] }
  0x72   :  { %1706 = vmatprep.subr.bf16.mxu0 %v1705_v50  ;;  %v171_v50 = vld [vmem:[#allocation5 + $0x288] sm:$0xff]  ;;  %v1471_v54 = vpack.c.bf16 %v168_v46, %v166_v45  ;;  %v437_v13 = vld [vmem:[#allocation5 + $0xad8] sm:$0xff]  ;;  %v178_v15 = vld [vmem:[#allocation5 + $0x2c0] sm:$0xff] }
  0x73   :  { %v436_v21 = vld [vmem:[#allocation5 + $0xad0] sm:$0xff]  ;;  %v81_v22 = vld [vmem:[#allocation2 + $0xd8] sm:$0xff]  ;;  %v1737_v23 = vpack.c.bf16 %v437_v13, %v435_v12  ;;  %v439_v27 = vld [vmem:[#allocation5 + $0xae8] sm:$0xff] }
  0x74   :  { %1452 = vmatpush1.bf16.msra.mxu1 %v1451_v56  ;;  %v1473_v56 = vpack.c.bf16 %v173_v51, %v171_v50  ;;  %v185_v25 = vld [vmem:[#allocation5 + $0x2f8] sm:$0xff]  ;;  %v72_v26 = vld [vmem:[#allocation2 + $0x90] sm:$0xff]  ;;  %v187_v40 = vld [vmem:[#allocation5 + $0x308] sm:$0xff] }
  0x75   :  { %1708 = vmatpush1.bf16.msra.mxu0 %v1707_v57  ;;  %1454 = vmatprep.subr.bf16.mxu1 %v1453_v58  ;;  %v170_v57 = vld [vmem:[#allocation5 + $0x280] sm:$0xff]  ;;  %v172_v58 = vld [vmem:[#allocation5 + $0x290] sm:$0xff]  ;;  %v441_v28 = vld [vmem:[#allocation5 + $0xaf8] sm:$0xff] }
  0x76   :  { %1710 = vmatprep.subr.bf16.mxu0 %v1709_v62  ;;  %v175_v62 = vld [vmem:[#allocation5 + $0x2a8] sm:$0xff]  ;;  %v1475_v2 = vpack.c.bf16 %v172_v58, %v170_v57  ;;  %v80_v29 = vld [vmem:[#allocation2 + $0xd0] sm:$0xff]  ;;  %v65_v37 = vld [vmem:[#allocation2 + $0x58] sm:$0xff]  ;;  %v1741_v38 = vpack.c.bf16 %v441_v28, %v439_v27 }
  0x77   :  { %v184_v35 = vld [vmem:[#allocation5 + $0x2f0] sm:$0xff]  ;;  %v189_v41 = vld [vmem:[#allocation5 + $0x318] sm:$0xff]  ;;  %v186_v47 = vld [vmem:[#allocation5 + $0x300] sm:$0xff] }
  0x78   :  { %1456 = vmatpush1.bf16.msra.mxu1 %v1455_v4  ;;  %v1477_v4 = vpack.c.bf16 %v177_v63, %v175_v62  ;;  %v440_v39 = vld [vmem:[#allocation5 + $0xaf0] sm:$0xff]  ;;  %v1489_v46 = vpack.c.bf16 %v189_v41, %v187_v40  ;;  %v442_v49 = vld [vmem:[#allocation5 + $0xb00] sm:$0xff]  ;;  %v191_v52 = vld [vmem:[#allocation5 + $0x328] sm:$0xff] }
  0x79   :  { %1712 = vmatpush1.bf16.msra.mxu0 %v1711_v5  ;;  %1458 = vmatprep.subr.bf16.mxu1 %v1457_v6  ;;  %v174_v5 = vld [vmem:[#allocation5 + $0x2a0] sm:$0xff]  ;;  %v176_v6 = vld [vmem:[#allocation5 + $0x2b0] sm:$0xff]  ;;  %v193_v53 = vld [vmem:[#allocation5 + $0x338] sm:$0xff] }
  0x7a   :  { %1714 = vmatprep.subr.bf16.mxu0 %v1713_v10  ;;  %v179_v10 = vld [vmem:[#allocation5 + $0x2c8] sm:$0xff]  ;;  %v1479_v14 = vpack.c.bf16 %v176_v6, %v174_v5  ;;  %v444_v51 = vld [vmem:[#allocation5 + $0xb10] sm:$0xff]  ;;  %v1493_v58 = vpack.c.bf16 %v193_v53, %v191_v52  ;;  %v190_v59 = vld [vmem:[#allocation5 + $0x320] sm:$0xff] }
  0x7b   :  { %743 = vmatmul.mubr.f32.vlgmr.msra.gmra.mrb[0].mxu1 %v54_v16  ;;  %v180_v16 = vld [vmem:[#allocation5 + $0x2d0] sm:$0xff]  ;;  %v1747_v57 = vpack.c.bf16 %v444_v51, %v442_v49  ;;  %v446_v61 = vld [vmem:[#allocation5 + $0xb20] sm:$0xff]  ;;  %v195_v0 = vld [vmem:[#allocation5 + $0x348] sm:$0xff] }
  0x7c   :  { %1460 = vmatpush1.bf16.msra.mxu1 %v1459_v17  ;;  %1051 = vmatmul.mubr.f32.vlgmr.msra.gmra.mrb[0].mxu0 %v62_v18  ;;  %v73_v17 = vld [vmem:[#allocation2 + $0x98] sm:$0xff]  ;;  %v1735_v18 = vpack.c.bf16 %v432_v9, %v430_v7  ;;  %v448_v63 = vld [vmem:[#allocation5 + $0xb30] sm:$0xff]  ;;  %v194_v7 = vld [vmem:[#allocation5 + $0x340] sm:$0xff] }
  0x7d   :  { %1716 = vmatpush1.bf16.msra.mxu0 %v1715_v19  ;;  %1462 = vmatprep.subr.bf16.mxu1 %v1461_v20  ;;  %v1481_v19 = vpack.c.bf16 %v181_v11, %v179_v10  ;;  %v434_v20 = vld [vmem:[#allocation5 + $0xac0] sm:$0xff]  ;;  %v197_v1 = vld [vmem:[#allocation5 + $0x358] sm:$0xff]  ;;  %v1751_v5 = vpack.c.bf16 %v448_v63, %v446_v61  ;;  %v452_v11 = vld [vmem:[#allocation5 + $0xb50] sm:$0xff] }
  0x7e   :  { %1718 = vmatprep.subr.bf16.mxu0 %v1717_v24  ;;  %v183_v24 = vld [vmem:[#allocation5 + $0x2e8] sm:$0xff]  ;;  %748 = vmatprep.mubr.f32.mxu1 %v73_v17  ;;  %v1739_v33 = vpack.c.bf16 %v436_v21, %v434_v20  ;;  %v1497_v6 = vpack.c.bf16 %v197_v1, %v195_v0  ;;  %v450_v9 = vld [vmem:[#allocation5 + $0xb40] sm:$0xff]  ;;  %v201_v13 = vld [vmem:[#allocation5 + $0x378] sm:$0xff] }
  0x7f   :  { %1056 = vmatprep.mubr.f32.mxu0 %v81_v22  ;;  %749 = vmatmul.mubr.f32.gmra.mrb[2].mxu1 %v72_v26  ;;  %v1485_v34 = vpack.c.bf16 %v185_v25, %v183_v24  ;;  %v199_v12 = vld [vmem:[#allocation5 + $0x368] sm:$0xff]  ;;  %v1755_v17 = vpack.c.bf16 %v452_v11, %v450_v9  ;;  %v200_v20 = vld [vmem:[#allocation5 + $0x370] sm:$0xff]  ;;  %v454_v21 = vld [vmem:[#allocation5 + $0xb60] sm:$0xff] }
  0x80   :  { %1464 = vmatpush1.bf16.msra.mxu1 %v1463_v30  ;;  %v1483_v30 = vpack.c.bf16 %v180_v16, %v178_v15  ;;  %1057 = vmatmul.mubr.f32.gmra.mrb[2].mxu0 %v80_v29  ;;  %v457_v15 = vld [vmem:[#allocation5 + $0xb78] sm:$0xff]  ;;  %v203_v24 = vld [vmem:[#allocation5 + $0x388] sm:$0xff] }
  0x81   :  { %1720 = vmatpush1.bf16.msra.mxu0 %v1719_v31  ;;  %1466 = vmatprep.subr.bf16.mxu1 %v1465_v32  ;;  %v182_v31 = vld [vmem:[#allocation5 + $0x2e0] sm:$0xff]  ;;  %v57_v32 = vld [vmem:[#allocation2 + $0x18] sm:$0xff]  ;;  %v459_v26 = vld [vmem:[#allocation5 + $0xb88] sm:$0xff] }
  0x82   :  { %1722 = vmatprep.subr.bf16.mxu0 %v1721_v36  ;;  %v438_v36 = vld [vmem:[#allocation5 + $0xae0] sm:$0xff]  ;;  %819 = vmatprep.mubr.f32.mxu1 %v57_v32  ;;  %v205_v25 = vld [vmem:[#allocation5 + $0x398] sm:$0xff]  ;;  %v204_v32 = vld [vmem:[#allocation5 + $0x390] sm:$0xff] }
  0x83   :  { %1127 = vmatprep.mubr.f32.mxu0 %v65_v37  ;;  %v1743_v45 = vpack.c.bf16 %v440_v39, %v438_v36  ;;  %v461_v27 = vld [vmem:[#allocation5 + $0xb98] sm:$0xff]  ;;  %v207_v36 = vld [vmem:[#allocation5 + $0x3a8] sm:$0xff] }
  0x84   :  { %1468 = vmatpush1.bf16.msra.mxu1 %v1467_v42  ;;  %v443_v42 = vld [vmem:[#allocation5 + $0xb08] sm:$0xff]  ;;  %v209_v37 = vld [vmem:[#allocation5 + $0x3b8] sm:$0xff] }
  0x85   :  { %1724 = vmatpush1.bf16.msra.mxu0 %v1723_v43  ;;  %1470 = vmatprep.subr.bf16.mxu1 %v1469_v44  ;;  %v445_v43 = vld [vmem:[#allocation5 + $0xb18] sm:$0xff]  ;;  %v1487_v44 = vpack.c.bf16 %v184_v35, %v182_v31  ;;  %v202_v31 = vld [vmem:[#allocation5 + $0x380] sm:$0xff]  ;;  %v460_v35 = vld [vmem:[#allocation5 + $0xb90] sm:$0xff] }
  0x86   :  { %1726 = vmatprep.subr.bf16.mxu0 %v1725_v48  ;;  %v188_v48 = vld [vmem:[#allocation5 + $0x310] sm:$0xff]  ;;  %v1745_v50 = vpack.c.bf16 %v445_v43, %v443_v42  ;;  %v465_v39 = vld [vmem:[#allocation5 + $0xbb8] sm:$0xff]  ;;  %v1507_v40 = vpack.c.bf16 %v204_v32, %v202_v31  ;;  %v1509_v42 = vpack.c.bf16 %v209_v37, %v207_v36  ;;  %v206_v43 = vld [vmem:[#allocation5 + $0x3a0] sm:$0xff] }
  0x87   :  { %v213_v49 = vld [vmem:[#allocation5 + $0x3d8] sm:$0xff]  ;;  %v478_v31 = vld [vmem:[#allocation5 + $0xc20] sm:$0xff]  ;;  %v483_v36 = vld [vmem:[#allocation5 + $0xc48] sm:$0xff] }
  0x88   :  { %1472 = vmatpush1.bf16.msra.mxu1 %v1471_v54  ;;  %v447_v54 = vld [vmem:[#allocation5 + $0xb28] sm:$0xff]  ;;  %v469_v51 = vld [vmem:[#allocation5 + $0xbd8] sm:$0xff] }
  0x89   :  { %1728 = vmatpush1.bf16.msra.mxu0 %v1727_v55  ;;  %1474 = vmatprep.subr.bf16.mxu1 %v1473_v56  ;;  %v449_v55 = vld [vmem:[#allocation5 + $0xb38] sm:$0xff]  ;;  %v1491_v56 = vpack.c.bf16 %v188_v48, %v186_v47  ;;  %v464_v47 = vld [vmem:[#allocation5 + $0xbb0] sm:$0xff]  ;;  %v211_v48 = vld [vmem:[#allocation5 + $0x3c8] sm:$0xff] }
  0x8a   :  { %1730 = vmatprep.subr.bf16.mxu0 %v1729_v60  ;;  %v192_v60 = vld [vmem:[#allocation5 + $0x330] sm:$0xff]  ;;  %v1749_v62 = vpack.c.bf16 %v449_v55, %v447_v54  ;;  %v1513_v54 = vpack.c.bf16 %v213_v49, %v211_v48  ;;  %v210_v55 = vld [vmem:[#allocation5 + $0x3c0] sm:$0xff]  ;;  %v217_v61 = vld [vmem:[#allocation5 + $0x3f8] sm:$0xff] }
  0x8b   :  { %v473_v63 = vld [vmem:[#allocation5 + $0xbf8] sm:$0xff]  ;;  %v484_v49 = vld [vmem:[#allocation5 + $0xc50] sm:$0xff] }
  0x8c   :  { %1476 = vmatpush1.bf16.msra.mxu1 %v1475_v2  ;;  %v451_v2 = vld [vmem:[#allocation5 + $0xb48] sm:$0xff]  ;;  %v221_v9 = vld [vmem:[#allocation5 + $0x418] sm:$0xff] }
  0x8d   :  { %1732 = vmatpush1.bf16.msra.mxu0 %v1731_v3  ;;  %1478 = vmatprep.subr.bf16.mxu1 %v1477_v4  ;;  %v453_v3 = vld [vmem:[#allocation5 + $0xb58] sm:$0xff]  ;;  %v1495_v4 = vpack.c.bf16 %v192_v60, %v190_v59  ;;  %v468_v59 = vld [vmem:[#allocation5 + $0xbd0] sm:$0xff]  ;;  %v215_v60 = vld [vmem:[#allocation5 + $0x3e8] sm:$0xff] }
  0x8e   :  { %1734 = vmatprep.subr.bf16.mxu0 %v1733_v8  ;;  %v196_v8 = vld [vmem:[#allocation5 + $0x350] sm:$0xff]  ;;  %v1753_v10 = vpack.c.bf16 %v453_v3, %v451_v2  ;;  %v1517_v2 = vpack.c.bf16 %v217_v61, %v215_v60  ;;  %v214_v3 = vld [vmem:[#allocation5 + $0x3e0] sm:$0xff]  ;;  %v477_v11 = vld [vmem:[#allocation5 + $0xc18] sm:$0xff] }
  0x8f   :  { %v1499_v16 = vpack.c.bf16 %v196_v8, %v194_v7  ;;  %v472_v7 = vld [vmem:[#allocation5 + $0xbf0] sm:$0xff]  ;;  %v219_v8 = vld [vmem:[#allocation5 + $0x408] sm:$0xff]  ;;  %v485_v37 = vld [vmem:[#allocation5 + $0xc58] sm:$0xff] }
  0x90   :  { %1480 = vmatpush1.bf16.msra.mxu1 %v1479_v14  ;;  %v455_v14 = vld [vmem:[#allocation5 + $0xb68] sm:$0xff]  ;;  %v1785_v48 = vpack.c.bf16 %v485_v37, %v483_v36  ;;  %v232_v60 = vld [vmem:[#allocation5 + $0x470] sm:$0xff]  ;;  %v486_v61 = vld [vmem:[#allocation5 + $0xc60] sm:$0xff] }
  0x91   :  { %1736 = vmatpush1.bf16.msra.mxu0 %v1735_v18  ;;  %1482 = vmatprep.subr.bf16.mxu1 %v1481_v19  ;;  %v1501_v18 = vpack.c.bf16 %v201_v13, %v199_v12  ;;  %v198_v19 = vld [vmem:[#allocation5 + $0x360] sm:$0xff]  ;;  %v1757_v22 = vpack.c.bf16 %v457_v15, %v455_v14  ;;  %v1521_v14 = vpack.c.bf16 %v221_v9, %v219_v8  ;;  %v236_v8 = vld [vmem:[#allocation5 + $0x490] sm:$0xff]  ;;  %v247_v36 = vld [vmem:[#allocation5 + $0x4e8] sm:$0xff] }
  0x92   :  { %1738 = vmatprep.subr.bf16.mxu0 %v1737_v23  ;;  %v456_v23 = vld [vmem:[#allocation5 + $0xb70] sm:$0xff]  ;;  %v1503_v28 = vpack.c.bf16 %v200_v20, %v198_v19  ;;  %v218_v15 = vld [vmem:[#allocation5 + $0x400] sm:$0xff]  ;;  %v223_v20 = vld [vmem:[#allocation5 + $0x428] sm:$0xff] }
  0x93   :  { %v1759_v29 = vpack.c.bf16 %v456_v23, %v454_v21  ;;  %v476_v19 = vld [vmem:[#allocation5 + $0xc10] sm:$0xff]  ;;  %v225_v21 = vld [vmem:[#allocation5 + $0x438] sm:$0xff]  ;;  %v490_v9 = vld [vmem:[#allocation5 + $0xc80] sm:$0xff] }
  0x94   :  { %1484 = vmatpush1.bf16.msra.mxu1 %v1483_v30  ;;  %v1505_v30 = vpack.c.bf16 %v205_v25, %v203_v24  ;;  %v481_v23 = vld [vmem:[#allocation5 + $0xc38] sm:$0xff]  ;;  %v56_v24 = vld [vmem:[#allocation2 + $0x10] sm:$0xff] }
  0x95   :  { %1740 = vmatpush1.bf16.msra.mxu0 %v1739_v33  ;;  %1486 = vmatprep.subr.bf16.mxu1 %v1485_v34  ;;  %v458_v33 = vld [vmem:[#allocation5 + $0xb80] sm:$0xff]  ;;  %v1761_v34 = vpack.c.bf16 %v461_v27, %v459_v26  ;;  %v64_v26 = vld [vmem:[#allocation2 + $0x50] sm:$0xff]  ;;  %v249_v37 = vld [vmem:[#allocation5 + $0x4f8] sm:$0xff] }
  0x96   :  { %1742 = vmatprep.subr.bf16.mxu0 %v1741_v38  ;;  %v463_v38 = vld [vmem:[#allocation5 + $0xba8] sm:$0xff]  ;;  %v1763_v41 = vpack.c.bf16 %v460_v35, %v458_v33  ;;  %v480_v33 = vld [vmem:[#allocation5 + $0xc30] sm:$0xff]  ;;  %v229_v35 = vld [vmem:[#allocation5 + $0x458] sm:$0xff] }
  0x98   :  { %1488 = vmatpush1.bf16.msra.mxu1 %v1487_v44  ;;  %v208_v44 = vld [vmem:[#allocation5 + $0x3b0] sm:$0xff] }
  0x99   :  { %1744 = vmatpush1.bf16.msra.mxu0 %v1743_v45  ;;  %1490 = vmatprep.subr.bf16.mxu1 %v1489_v46  ;;  %v462_v45 = vld [vmem:[#allocation5 + $0xba0] sm:$0xff]  ;;  %v1765_v46 = vpack.c.bf16 %v465_v39, %v463_v38  ;;  %v1511_v52 = vpack.c.bf16 %v208_v44, %v206_v43  ;;  %v75_v38 = vld [vmem:[#allocation2 + $0xa8] sm:$0xff]  ;;  %v1783_v43 = vpack.c.bf16 %v480_v33, %v478_v31 }
  0x9a   :  { %1746 = vmatprep.subr.bf16.mxu0 %v1745_v50  ;;  %v467_v50 = vld [vmem:[#allocation5 + $0xbc8] sm:$0xff]  ;;  %v1767_v53 = vpack.c.bf16 %v464_v47, %v462_v45  ;;  %v228_v45 = vld [vmem:[#allocation5 + $0x450] sm:$0xff]  ;;  %v82_v47 = vld [vmem:[#allocation2 + $0xe0] sm:$0xff] }
  0x9b   :  { %v242_v31 = vld [vmem:[#allocation5 + $0x4c0] sm:$0xff] }
  0x9c   :  { %1492 = vmatpush1.bf16.msra.mxu1 %v1491_v56  ;;  %v212_v56 = vld [vmem:[#allocation5 + $0x3d0] sm:$0xff]  ;;  %v498_v33 = vld [vmem:[#allocation5 + $0xcc0] sm:$0xff] }
  0x9d   :  { %1748 = vmatpush1.bf16.msra.mxu0 %v1747_v57  ;;  %1494 = vmatprep.subr.bf16.mxu1 %v1493_v58  ;;  %v466_v57 = vld [vmem:[#allocation5 + $0xbc0] sm:$0xff]  ;;  %v1769_v58 = vpack.c.bf16 %v469_v51, %v467_v50  ;;  %v1515_v0 = vpack.c.bf16 %v212_v56, %v210_v55  ;;  %v231_v50 = vld [vmem:[#allocation5 + $0x468] sm:$0xff]  ;;  %v233_v51 = vld [vmem:[#allocation5 + $0x478] sm:$0xff] }
  0x9e   :  { %1750 = vmatprep.subr.bf16.mxu0 %v1749_v62  ;;  %v471_v62 = vld [vmem:[#allocation5 + $0xbe8] sm:$0xff]  ;;  %v1771_v1 = vpack.c.bf16 %v468_v59, %v466_v57  ;;  %v230_v59 = vld [vmem:[#allocation5 + $0x460] sm:$0xff] }
  0x9f   :  { %v67_v56 = vld [vmem:[#allocation2 + $0x68] sm:$0xff] }
  0xa0   :  { %1496 = vmatpush1.bf16.msra.mxu1 %v1495_v4  ;;  %v216_v4 = vld [vmem:[#allocation5 + $0x3f0] sm:$0xff] }
  0xa1   :  { %1752 = vmatpush1.bf16.msra.mxu0 %v1751_v5  ;;  %1498 = vmatprep.subr.bf16.mxu1 %v1497_v6  ;;  %v470_v5 = vld [vmem:[#allocation5 + $0xbe0] sm:$0xff]  ;;  %v1773_v6 = vpack.c.bf16 %v473_v63, %v471_v62  ;;  %v1519_v12 = vpack.c.bf16 %v216_v4, %v214_v3  ;;  %v488_v63 = vld [vmem:[#allocation5 + $0xc70] sm:$0xff]  ;;  %v493_v3 = vld [vmem:[#allocation5 + $0xc98] sm:$0xff]  ;;  %v1535_v4 = vpack.c.bf16 %v232_v60, %v230_v59 }
  0xa2   :  { %1754 = vmatprep.subr.bf16.mxu0 %v1753_v10  ;;  %v475_v10 = vld [vmem:[#allocation5 + $0xc08] sm:$0xff]  ;;  %v1775_v13 = vpack.c.bf16 %v472_v7, %v470_v5  ;;  %v1791_v5 = vpack.c.bf16 %v488_v63, %v486_v61  ;;  %v234_v7 = vld [vmem:[#allocation5 + $0x480] sm:$0xff]  ;;  %v508_v59 = vld [vmem:[#allocation5 + $0xd10] sm:$0xff] }
  0xa3   :  { %v255_v60 = vld [vmem:[#allocation5 + $0x528] sm:$0xff]  ;;  %v257_v61 = vld [vmem:[#allocation5 + $0x538] sm:$0xff] }
  0xa4   :  { %1500 = vmatpush1.bf16.msra.mxu1 %v1499_v16  ;;  %v220_v16 = vld [vmem:[#allocation5 + $0x410] sm:$0xff]  ;;  %v513_v63 = vld [vmem:[#allocation5 + $0xd38] sm:$0xff] }
  0xa5   :  { %1756 = vmatpush1.bf16.msra.mxu0 %v1755_v17  ;;  %1502 = vmatprep.subr.bf16.mxu1 %v1501_v18  ;;  %v474_v17 = vld [vmem:[#allocation5 + $0xc00] sm:$0xff]  ;;  %v1777_v18 = vpack.c.bf16 %v477_v11, %v475_v10  ;;  %v1523_v25 = vpack.c.bf16 %v220_v16, %v218_v15  ;;  %v492_v11 = vld [vmem:[#allocation5 + $0xc90] sm:$0xff]  ;;  %v497_v15 = vld [vmem:[#allocation5 + $0xcb8] sm:$0xff]  ;;  %v1539_v16 = vpack.c.bf16 %v236_v8, %v234_v7 }
  0xa6   :  { %1758 = vmatprep.subr.bf16.mxu0 %v1757_v22  ;;  %v479_v22 = vld [vmem:[#allocation5 + $0xc28] sm:$0xff]  ;;  %v1779_v27 = vpack.c.bf16 %v476_v19, %v474_v17  ;;  %v1795_v17 = vpack.c.bf16 %v492_v11, %v490_v9  ;;  %v238_v19 = vld [vmem:[#allocation5 + $0x4a0] sm:$0xff]  ;;  %v512_v7 = vld [vmem:[#allocation5 + $0xd30] sm:$0xff] }
  0xa7   :  { %v1781_v32 = vpack.c.bf16 %v481_v23, %v479_v22  ;;  %v496_v23 = vld [vmem:[#allocation5 + $0xcb0] sm:$0xff]  ;;  %v259_v8 = vld [vmem:[#allocation5 + $0x548] sm:$0xff]  ;;  %v261_v9 = vld [vmem:[#allocation5 + $0x558] sm:$0xff] }
  0xa8   :  { %1504 = vmatpush1.bf16.msra.mxu1 %v1503_v28  ;;  %v1525_v28 = vpack.c.bf16 %v225_v21, %v223_v20  ;;  %v240_v20 = vld [vmem:[#allocation5 + $0x4b0] sm:$0xff]  ;;  %v494_v21 = vld [vmem:[#allocation5 + $0xca0] sm:$0xff]  ;;  %v517_v11 = vld [vmem:[#allocation5 + $0xd58] sm:$0xff] }
  0xa9   :  { %1760 = vmatpush1.bf16.msra.mxu0 %v1759_v29  ;;  %1506 = vmatprep.subr.bf16.mxu1 %v1505_v30  ;;  %v222_v29 = vld [vmem:[#allocation5 + $0x420] sm:$0xff]  ;;  %v224_v30 = vld [vmem:[#allocation5 + $0x430] sm:$0xff] }
  0xaa   :  { %1762 = vmatprep.subr.bf16.mxu0 %v1761_v34  ;;  %v227_v34 = vld [vmem:[#allocation5 + $0x448] sm:$0xff]  ;;  %v1527_v39 = vpack.c.bf16 %v224_v30, %v222_v29  ;;  %v1799_v29 = vpack.c.bf16 %v496_v23, %v494_v21  ;;  %v265_v21 = vld [vmem:[#allocation5 + $0x578] sm:$0xff] }
  0xab   :  { %v1529_v44 = vpack.c.bf16 %v229_v35, %v227_v34  ;;  %v500_v35 = vld [vmem:[#allocation5 + $0xcd0] sm:$0xff]  ;;  %v521_v23 = vld [vmem:[#allocation5 + $0xd78] sm:$0xff] }
  0xac   :  { %1508 = vmatpush1.bf16.msra.mxu1 %v1507_v40  ;;  %v226_v40 = vld [vmem:[#allocation5 + $0x440] sm:$0xff] }
  0xad   :  { %1764 = vmatpush1.bf16.msra.mxu0 %v1763_v41  ;;  %1510 = vmatprep.subr.bf16.mxu1 %v1509_v42  ;;  %v83_v41 = vld [vmem:[#allocation2 + $0xe8] sm:$0xff]  ;;  %v74_v42 = vld [vmem:[#allocation2 + $0xa0] sm:$0xff]  ;;  %v1531_v55 = vpack.c.bf16 %v228_v45, %v226_v40 }
  0xae   :  { %1766 = vmatprep.subr.bf16.mxu0 %v1765_v46  ;;  %v482_v46 = vld [vmem:[#allocation5 + $0xc40] sm:$0xff] }
  0xaf   :  { %v1787_v57 = vpack.c.bf16 %v484_v49, %v482_v46  ;;  %v502_v45 = vld [vmem:[#allocation5 + $0xce0] sm:$0xff]  ;;  %v253_v49 = vld [vmem:[#allocation5 + $0x518] sm:$0xff] }
  0xb0   :  { %1512 = vmatpush1.bf16.msra.mxu1 %v1511_v52  ;;  %v487_v52 = vld [vmem:[#allocation5 + $0xc68] sm:$0xff] }
  0xb1   :  { %1768 = vmatpush1.bf16.msra.mxu0 %v1767_v53  ;;  %1514 = vmatprep.subr.bf16.mxu1 %v1513_v54  ;;  %v489_v53 = vld [vmem:[#allocation5 + $0xc78] sm:$0xff]  ;;  %v59_v54 = vld [vmem:[#allocation2 + $0x28] sm:$0xff] }
  0xb2   :  { %1770 = vmatprep.subr.bf16.mxu0 %v1769_v58  ;;  %v1533_v58 = vpack.c.bf16 %v233_v51, %v231_v50  ;;  %v1789_v62 = vpack.c.bf16 %v489_v53, %v487_v52  ;;  %v507_v50 = vld [vmem:[#allocation5 + $0xd08] sm:$0xff]  ;;  %v509_v51 = vld [vmem:[#allocation5 + $0xd18] sm:$0xff] }
  0xb4   :  { %1516 = vmatpush1.bf16.msra.mxu1 %v1515_v0  ;;  %v235_v0 = vld [vmem:[#allocation5 + $0x488] sm:$0xff] }
  0xb5   :  { %1772 = vmatpush1.bf16.msra.mxu0 %v1771_v1  ;;  %1518 = vmatprep.subr.bf16.mxu1 %v1517_v2  ;;  %v237_v1 = vld [vmem:[#allocation5 + $0x498] sm:$0xff]  ;;  %v491_v2 = vld [vmem:[#allocation5 + $0xc88] sm:$0xff] }
  0xb6   :  { %1774 = vmatprep.subr.bf16.mxu0 %v1773_v6  ;;  %v1537_v6 = vpack.c.bf16 %v237_v1, %v235_v0  ;;  %v1793_v10 = vpack.c.bf16 %v493_v3, %v491_v2  ;;  %v1557_v2 = vpack.c.bf16 %v257_v61, %v255_v60  ;;  %v254_v3 = vld [vmem:[#allocation5 + $0x520] sm:$0xff] }
  0xb8   :  { %1520 = vmatpush1.bf16.msra.mxu1 %v1519_v12  ;;  %v239_v12 = vld [vmem:[#allocation5 + $0x4a8] sm:$0xff] }
  0xb9   :  { %1776 = vmatpush1.bf16.msra.mxu0 %v1775_v13  ;;  %1522 = vmatprep.subr.bf16.mxu1 %v1521_v14  ;;  %v241_v13 = vld [vmem:[#allocation5 + $0x4b8] sm:$0xff]  ;;  %v495_v14 = vld [vmem:[#allocation5 + $0xca8] sm:$0xff] }
  0xba   :  { %1778 = vmatprep.subr.bf16.mxu0 %v1777_v18  ;;  %v1541_v18 = vpack.c.bf16 %v241_v13, %v239_v12  ;;  %v1797_v22 = vpack.c.bf16 %v497_v15, %v495_v14  ;;  %v1561_v14 = vpack.c.bf16 %v261_v9, %v259_v8  ;;  %v258_v15 = vld [vmem:[#allocation5 + $0x540] sm:$0xff] }
  0xbb   :  { %820 = vmatmul.mubr.f32.vlgmr.msra.gmra.mrb[0].mxu1 %v56_v24  ;;  %v243_v24 = vld [vmem:[#allocation5 + $0x4c8] sm:$0xff] }
  0xbc   :  { %1524 = vmatpush1.bf16.msra.mxu1 %v1523_v25  ;;  %1128 = vmatmul.mubr.f32.vlgmr.msra.gmra.mrb[0].mxu0 %v64_v26  ;;  %v245_v25 = vld [vmem:[#allocation5 + $0x4d8] sm:$0xff]  ;;  %v499_v26 = vld [vmem:[#allocation5 + $0xcc8] sm:$0xff] }
  0xbd   :  { %1780 = vmatpush1.bf16.msra.mxu0 %v1779_v27  ;;  %1526 = vmatprep.subr.bf16.mxu1 %v1525_v28  ;;  %v501_v27 = vld [vmem:[#allocation5 + $0xcd8] sm:$0xff]  ;;  %v1543_v28 = vpack.c.bf16 %v240_v20, %v238_v19  ;;  %v1545_v30 = vpack.c.bf16 %v245_v25, %v243_v24  ;;  %v516_v19 = vld [vmem:[#allocation5 + $0xd50] sm:$0xff]  ;;  %v263_v20 = vld [vmem:[#allocation5 + $0x568] sm:$0xff] }
  0xbe   :  { %1782 = vmatprep.subr.bf16.mxu0 %v1781_v32  ;;  %825 = vmatprep.mubr.f32.mxu1 %v75_v38  ;;  %v244_v32 = vld [vmem:[#allocation5 + $0x4d0] sm:$0xff]  ;;  %v1801_v34 = vpack.c.bf16 %v501_v27, %v499_v26  ;;  %v503_v38 = vld [vmem:[#allocation5 + $0xce8] sm:$0xff]  ;;  %v1565_v26 = vpack.c.bf16 %v265_v21, %v263_v20  ;;  %v262_v27 = vld [vmem:[#allocation5 + $0x560] sm:$0xff] }
  0xbf   :  { %1133 = vmatprep.mubr.f32.mxu0 %v83_v41  ;;  %826 = vmatmul.mubr.f32.gmra.mrb[2].mxu1 %v74_v42  ;;  %v1547_v40 = vpack.c.bf16 %v244_v32, %v242_v31  ;;  %v1803_v41 = vpack.c.bf16 %v500_v35, %v498_v33  ;;  %v1549_v42 = vpack.c.bf16 %v249_v37, %v247_v36  ;;  %v520_v31 = vld [vmem:[#allocation5 + $0xd70] sm:$0xff]  ;;  %v267_v32 = vld [vmem:[#allocation5 + $0x588] sm:$0xff]  ;;  %v269_v33 = vld [vmem:[#allocation5 + $0x598] sm:$0xff] }
  0xc0   :  { %1528 = vmatpush1.bf16.msra.mxu1 %v1527_v39  ;;  %1134 = vmatmul.mubr.f32.gmra.mrb[2].mxu0 %v82_v47  ;;  %v505_v39 = vld [vmem:[#allocation5 + $0xcf8] sm:$0xff]  ;;  %v504_v47 = vld [vmem:[#allocation5 + $0xcf0] sm:$0xff] }
  0xc1   :  { %1784 = vmatpush1.bf16.msra.mxu0 %v1783_v43  ;;  %1530 = vmatprep.subr.bf16.mxu1 %v1529_v44  ;;  %v246_v43 = vld [vmem:[#allocation5 + $0x4e0] sm:$0xff]  ;;  %v248_v44 = vld [vmem:[#allocation5 + $0x4f0] sm:$0xff]  ;;  %v1805_v46 = vpack.c.bf16 %v505_v39, %v503_v38  ;;  %v1807_v53 = vpack.c.bf16 %v504_v47, %v502_v45  ;;  %v525_v35 = vld [vmem:[#allocation5 + $0xd98] sm:$0xff]  ;;  %v1569_v38 = vpack.c.bf16 %v269_v33, %v267_v32 }
  0xc2   :  { %1786 = vmatprep.subr.bf16.mxu0 %v1785_v48  ;;  %896 = vmatprep.mubr.f32.mxu1 %v59_v54  ;;  %v251_v48 = vld [vmem:[#allocation5 + $0x508] sm:$0xff]  ;;  %v1551_v52 = vpack.c.bf16 %v248_v44, %v246_v43  ;;  %v266_v39 = vld [vmem:[#allocation5 + $0x580] sm:$0xff]  ;;  %v524_v43 = vld [vmem:[#allocation5 + $0xd90] sm:$0xff] }
  0xc3   :  { %1204 = vmatprep.mubr.f32.mxu0 %v67_v56  ;;  %v1553_v54 = vpack.c.bf16 %v253_v49, %v251_v48  ;;  %v252_v56 = vld [vmem:[#allocation5 + $0x510] sm:$0xff]  ;;  %v271_v44 = vld [vmem:[#allocation5 + $0x5a8] sm:$0xff]  ;;  %v273_v45 = vld [vmem:[#allocation5 + $0x5b8] sm:$0xff] }
  0xc4   :  { %1532 = vmatpush1.bf16.msra.mxu1 %v1531_v55  ;;  %v250_v55 = vld [vmem:[#allocation5 + $0x500] sm:$0xff]  ;;  %v529_v47 = vld [vmem:[#allocation5 + $0xdb8] sm:$0xff] }
  0xc5   :  { %1788 = vmatpush1.bf16.msra.mxu0 %v1787_v57  ;;  %1534 = vmatprep.subr.bf16.mxu1 %v1533_v58  ;;  %v506_v57 = vld [vmem:[#allocation5 + $0xd00] sm:$0xff]  ;;  %v1809_v58 = vpack.c.bf16 %v509_v51, %v507_v50  ;;  %v1555_v0 = vpack.c.bf16 %v252_v56, %v250_v55  ;;  %v1573_v50 = vpack.c.bf16 %v273_v45, %v271_v44  ;;  %v528_v55 = vld [vmem:[#allocation5 + $0xdb0] sm:$0xff]  ;;  %v275_v56 = vld [vmem:[#allocation5 + $0x5c8] sm:$0xff] }
  0xc6   :  { %1790 = vmatprep.subr.bf16.mxu0 %v1789_v62  ;;  %v511_v62 = vld [vmem:[#allocation5 + $0xd28] sm:$0xff]  ;;  %v1811_v1 = vpack.c.bf16 %v508_v59, %v506_v57  ;;  %v270_v51 = vld [vmem:[#allocation5 + $0x5a0] sm:$0xff]  ;;  %v277_v57 = vld [vmem:[#allocation5 + $0x5d8] sm:$0xff] }
  0xc7   :  { %v533_v59 = vld [vmem:[#allocation5 + $0xdd8] sm:$0xff]  ;;  %v58_v32 = vld [vmem:[#allocation2 + $0x20] sm:$0xff]  ;;  %v547_v44 = vld [vmem:[#allocation5 + $0xe48] sm:$0xff] }
  0xc8   :  { %1536 = vmatpush1.bf16.msra.mxu1 %v1535_v4  ;;  %v256_v4 = vld [vmem:[#allocation5 + $0x530] sm:$0xff]  ;;  %v549_v45 = vld [vmem:[#allocation5 + $0xe58] sm:$0xff] }
  0xc9   :  { %1792 = vmatpush1.bf16.msra.mxu0 %v1791_v5  ;;  %1538 = vmatprep.subr.bf16.mxu1 %v1537_v6  ;;  %v510_v5 = vld [vmem:[#allocation5 + $0xd20] sm:$0xff]  ;;  %v1813_v6 = vpack.c.bf16 %v513_v63, %v511_v62  ;;  %v1559_v12 = vpack.c.bf16 %v256_v4, %v254_v3  ;;  %v1577_v62 = vpack.c.bf16 %v277_v57, %v275_v56  ;;  %v532_v3 = vld [vmem:[#allocation5 + $0xdd0] sm:$0xff]  ;;  %v279_v4 = vld [vmem:[#allocation5 + $0x5e8] sm:$0xff] }
  0xca   :  { %1794 = vmatprep.subr.bf16.mxu0 %v1793_v10  ;;  %v515_v10 = vld [vmem:[#allocation5 + $0xd48] sm:$0xff]  ;;  %v1815_v13 = vpack.c.bf16 %v512_v7, %v510_v5  ;;  %v274_v63 = vld [vmem:[#allocation5 + $0x5c0] sm:$0xff]  ;;  %v281_v5 = vld [vmem:[#allocation5 + $0x5f8] sm:$0xff]  ;;  %v1849_v56 = vpack.c.bf16 %v549_v45, %v547_v44 }
  0xcb   :  { %v537_v7 = vld [vmem:[#allocation5 + $0xdf8] sm:$0xff]  ;;  %v548_v57 = vld [vmem:[#allocation5 + $0xe50] sm:$0xff]  ;;  %v311_v44 = vld [vmem:[#allocation5 + $0x6e8] sm:$0xff] }
  0xcc   :  { %1540 = vmatpush1.bf16.msra.mxu1 %v1539_v16  ;;  %v260_v16 = vld [vmem:[#allocation5 + $0x550] sm:$0xff]  ;;  %v313_v45 = vld [vmem:[#allocation5 + $0x6f8] sm:$0xff] }
  0xcd   :  { %1796 = vmatpush1.bf16.msra.mxu0 %v1795_v17  ;;  %1542 = vmatprep.subr.bf16.mxu1 %v1541_v18  ;;  %v514_v17 = vld [vmem:[#allocation5 + $0xd40] sm:$0xff]  ;;  %v1817_v18 = vpack.c.bf16 %v517_v11, %v515_v10  ;;  %v1563_v24 = vpack.c.bf16 %v260_v16, %v258_v15  ;;  %v1581_v10 = vpack.c.bf16 %v281_v5, %v279_v4  ;;  %v536_v15 = vld [vmem:[#allocation5 + $0xdf0] sm:$0xff]  ;;  %v283_v16 = vld [vmem:[#allocation5 + $0x608] sm:$0xff] }
  0xce   :  { %1798 = vmatprep.subr.bf16.mxu0 %v1797_v22  ;;  %v519_v22 = vld [vmem:[#allocation5 + $0xd68] sm:$0xff]  ;;  %v1819_v25 = vpack.c.bf16 %v516_v19, %v514_v17  ;;  %v278_v11 = vld [vmem:[#allocation5 + $0x5e0] sm:$0xff]  ;;  %v285_v17 = vld [vmem:[#allocation5 + $0x618] sm:$0xff] }
  0xcf   :  { %v541_v19 = vld [vmem:[#allocation5 + $0xe18] sm:$0xff]  ;;  %v296_v4 = vld [vmem:[#allocation5 + $0x670] sm:$0xff]  ;;  %v550_v5 = vld [vmem:[#allocation5 + $0xe60] sm:$0xff] }
  0xd0   :  { %1544 = vmatpush1.bf16.msra.mxu1 %v1543_v28  ;;  %v264_v28 = vld [vmem:[#allocation5 + $0x570] sm:$0xff] }
  0xd1   :  { %1800 = vmatpush1.bf16.msra.mxu0 %v1799_v29  ;;  %1546 = vmatprep.subr.bf16.mxu1 %v1545_v30  ;;  %v518_v29 = vld [vmem:[#allocation5 + $0xd60] sm:$0xff]  ;;  %v1821_v30 = vpack.c.bf16 %v521_v23, %v519_v22  ;;  %v1567_v36 = vpack.c.bf16 %v264_v28, %v262_v27  ;;  %v1585_v22 = vpack.c.bf16 %v285_v17, %v283_v16  ;;  %v540_v27 = vld [vmem:[#allocation5 + $0xe10] sm:$0xff]  ;;  %v287_v28 = vld [vmem:[#allocation5 + $0x628] sm:$0xff] }
  0xd2   :  { %1802 = vmatprep.subr.bf16.mxu0 %v1801_v34  ;;  %v523_v34 = vld [vmem:[#allocation5 + $0xd88] sm:$0xff]  ;;  %v1823_v37 = vpack.c.bf16 %v520_v31, %v518_v29  ;;  %v282_v23 = vld [vmem:[#allocation5 + $0x600] sm:$0xff]  ;;  %v289_v29 = vld [vmem:[#allocation5 + $0x638] sm:$0xff] }
  0xd3   :  { %v545_v31 = vld [vmem:[#allocation5 + $0xe38] sm:$0xff]  ;;  %v300_v16 = vld [vmem:[#allocation5 + $0x690] sm:$0xff]  ;;  %v554_v17 = vld [vmem:[#allocation5 + $0xe80] sm:$0xff] }
  0xd4   :  { %1548 = vmatpush1.bf16.msra.mxu1 %v1547_v40  ;;  %v268_v40 = vld [vmem:[#allocation5 + $0x590] sm:$0xff] }
  0xd5   :  { %1804 = vmatpush1.bf16.msra.mxu0 %v1803_v41  ;;  %1550 = vmatprep.subr.bf16.mxu1 %v1549_v42  ;;  %v522_v41 = vld [vmem:[#allocation5 + $0xd80] sm:$0xff]  ;;  %v1825_v42 = vpack.c.bf16 %v525_v35, %v523_v34  ;;  %v1571_v48 = vpack.c.bf16 %v268_v40, %v266_v39 }
  0xd6   :  { %1806 = vmatprep.subr.bf16.mxu0 %v1805_v46  ;;  %v527_v46 = vld [vmem:[#allocation5 + $0xda8] sm:$0xff]  ;;  %v1827_v49 = vpack.c.bf16 %v524_v43, %v522_v41  ;;  %v66_v34 = vld [vmem:[#allocation2 + $0x60] sm:$0xff]  ;;  %v544_v41 = vld [vmem:[#allocation5 + $0xe30] sm:$0xff] }
  0xd7   :  { %v542_v39 = vld [vmem:[#allocation5 + $0xe20] sm:$0xff]  ;;  %v293_v43 = vld [vmem:[#allocation5 + $0x658] sm:$0xff] }
  0xd8   :  { %1552 = vmatpush1.bf16.msra.mxu1 %v1551_v52  ;;  %v272_v52 = vld [vmem:[#allocation5 + $0x5b0] sm:$0xff] }
  0xd9   :  { %1808 = vmatpush1.bf16.msra.mxu0 %v1807_v53  ;;  %1554 = vmatprep.subr.bf16.mxu1 %v1553_v54  ;;  %v526_v53 = vld [vmem:[#allocation5 + $0xda0] sm:$0xff]  ;;  %v1829_v54 = vpack.c.bf16 %v529_v47, %v527_v46  ;;  %v1575_v60 = vpack.c.bf16 %v272_v52, %v270_v51  ;;  %v77_v46 = vld [vmem:[#allocation2 + $0xb8] sm:$0xff]  ;;  %v1847_v51 = vpack.c.bf16 %v544_v41, %v542_v39 }
  0xda   :  { %1810 = vmatprep.subr.bf16.mxu0 %v1809_v58  ;;  %v531_v58 = vld [vmem:[#allocation5 + $0xdc8] sm:$0xff]  ;;  %v1831_v61 = vpack.c.bf16 %v528_v55, %v526_v53  ;;  %v292_v53 = vld [vmem:[#allocation5 + $0x650] sm:$0xff]  ;;  %v306_v39 = vld [vmem:[#allocation5 + $0x6c0] sm:$0xff] }
  0xdb   :  { %v84_v55 = vld [vmem:[#allocation2 + $0xf0] sm:$0xff]  ;;  %v562_v41 = vld [vmem:[#allocation5 + $0xec0] sm:$0xff] }
  0xdc   :  { %1556 = vmatpush1.bf16.msra.mxu1 %v1555_v0  ;;  %v276_v0 = vld [vmem:[#allocation5 + $0x5d0] sm:$0xff] }
  0xdd   :  { %1812 = vmatpush1.bf16.msra.mxu0 %v1811_v1  ;;  %1558 = vmatprep.subr.bf16.mxu1 %v1557_v2  ;;  %v530_v1 = vld [vmem:[#allocation5 + $0xdc0] sm:$0xff]  ;;  %v1833_v2 = vpack.c.bf16 %v533_v59, %v531_v58  ;;  %v1579_v8 = vpack.c.bf16 %v276_v0, %v274_v63  ;;  %v295_v58 = vld [vmem:[#allocation5 + $0x668] sm:$0xff]  ;;  %v297_v59 = vld [vmem:[#allocation5 + $0x678] sm:$0xff] }
  0xde   :  { %1814 = vmatprep.subr.bf16.mxu0 %v1813_v6  ;;  %v535_v6 = vld [vmem:[#allocation5 + $0xde8] sm:$0xff]  ;;  %v1835_v9 = vpack.c.bf16 %v532_v3, %v530_v1  ;;  %v69_v0 = vld [vmem:[#allocation2 + $0x78] sm:$0xff]  ;;  %v294_v3 = vld [vmem:[#allocation5 + $0x660] sm:$0xff] }
  0xe0   :  { %1560 = vmatpush1.bf16.msra.mxu1 %v1559_v12  ;;  %v280_v12 = vld [vmem:[#allocation5 + $0x5f0] sm:$0xff] }
  0xe1   :  { %1816 = vmatpush1.bf16.msra.mxu0 %v1815_v13  ;;  %1562 = vmatprep.subr.bf16.mxu1 %v1561_v14  ;;  %v534_v13 = vld [vmem:[#allocation5 + $0xde0] sm:$0xff]  ;;  %v1837_v14 = vpack.c.bf16 %v537_v7, %v535_v6  ;;  %v1583_v20 = vpack.c.bf16 %v280_v12, %v278_v11  ;;  %v552_v7 = vld [vmem:[#allocation5 + $0xe70] sm:$0xff]  ;;  %v557_v11 = vld [vmem:[#allocation5 + $0xe98] sm:$0xff]  ;;  %v1599_v12 = vpack.c.bf16 %v296_v4, %v294_v3 }
  0xe2   :  { %1818 = vmatprep.subr.bf16.mxu0 %v1817_v18  ;;  %v539_v18 = vld [vmem:[#allocation5 + $0xe08] sm:$0xff]  ;;  %v1839_v21 = vpack.c.bf16 %v536_v15, %v534_v13  ;;  %v1855_v13 = vpack.c.bf16 %v552_v7, %v550_v5  ;;  %v298_v15 = vld [vmem:[#allocation5 + $0x680] sm:$0xff]  ;;  %v572_v3 = vld [vmem:[#allocation5 + $0xf10] sm:$0xff] }
  0xe3   :  { %v319_v4 = vld [vmem:[#allocation5 + $0x728] sm:$0xff]  ;;  %v321_v5 = vld [vmem:[#allocation5 + $0x738] sm:$0xff] }
  0xe4   :  { %1564 = vmatpush1.bf16.msra.mxu1 %v1563_v24  ;;  %v284_v24 = vld [vmem:[#allocation5 + $0x610] sm:$0xff]  ;;  %v577_v7 = vld [vmem:[#allocation5 + $0xf38] sm:$0xff] }
  0xe5   :  { %1820 = vmatpush1.bf16.msra.mxu0 %v1819_v25  ;;  %1566 = vmatprep.subr.bf16.mxu1 %v1565_v26  ;;  %v538_v25 = vld [vmem:[#allocation5 + $0xe00] sm:$0xff]  ;;  %v1841_v26 = vpack.c.bf16 %v541_v19, %v539_v18  ;;  %v1587_v33 = vpack.c.bf16 %v284_v24, %v282_v23  ;;  %v556_v19 = vld [vmem:[#allocation5 + $0xe90] sm:$0xff]  ;;  %v561_v23 = vld [vmem:[#allocation5 + $0xeb8] sm:$0xff]  ;;  %v1603_v24 = vpack.c.bf16 %v300_v16, %v298_v15 }
  0xe6   :  { %1822 = vmatprep.subr.bf16.mxu0 %v1821_v30  ;;  %v543_v30 = vld [vmem:[#allocation5 + $0xe28] sm:$0xff]  ;;  %v1843_v35 = vpack.c.bf16 %v540_v27, %v538_v25  ;;  %v1859_v25 = vpack.c.bf16 %v556_v19, %v554_v17  ;;  %v302_v27 = vld [vmem:[#allocation5 + $0x6a0] sm:$0xff]  ;;  %v576_v15 = vld [vmem:[#allocation5 + $0xf30] sm:$0xff] }
  0xe7   :  { %v1845_v40 = vpack.c.bf16 %v545_v31, %v543_v30  ;;  %v560_v31 = vld [vmem:[#allocation5 + $0xeb0] sm:$0xff]  ;;  %v323_v16 = vld [vmem:[#allocation5 + $0x748] sm:$0xff]  ;;  %v325_v17 = vld [vmem:[#allocation5 + $0x758] sm:$0xff] }
  0xe8   :  { %1568 = vmatpush1.bf16.msra.mxu1 %v1567_v36  ;;  %v1589_v36 = vpack.c.bf16 %v289_v29, %v287_v28  ;;  %v304_v28 = vld [vmem:[#allocation5 + $0x6b0] sm:$0xff]  ;;  %v558_v29 = vld [vmem:[#allocation5 + $0xea0] sm:$0xff]  ;;  %v581_v19 = vld [vmem:[#allocation5 + $0xf58] sm:$0xff] }
  0xe9   :  { %1824 = vmatpush1.bf16.msra.mxu0 %v1823_v37  ;;  %1570 = vmatprep.subr.bf16.mxu1 %v1569_v38  ;;  %v286_v37 = vld [vmem:[#allocation5 + $0x620] sm:$0xff]  ;;  %v288_v38 = vld [vmem:[#allocation5 + $0x630] sm:$0xff] }
  0xea   :  { %1826 = vmatprep.subr.bf16.mxu0 %v1825_v42  ;;  %v291_v42 = vld [vmem:[#allocation5 + $0x648] sm:$0xff]  ;;  %v1591_v47 = vpack.c.bf16 %v288_v38, %v286_v37  ;;  %v1863_v37 = vpack.c.bf16 %v560_v31, %v558_v29  ;;  %v329_v29 = vld [vmem:[#allocation5 + $0x778] sm:$0xff] }
  0xeb   :  { %v1593_v52 = vpack.c.bf16 %v293_v43, %v291_v42  ;;  %v564_v43 = vld [vmem:[#allocation5 + $0xed0] sm:$0xff]  ;;  %v585_v31 = vld [vmem:[#allocation5 + $0xf78] sm:$0xff] }
  0xec   :  { %1572 = vmatpush1.bf16.msra.mxu1 %v1571_v48  ;;  %v290_v48 = vld [vmem:[#allocation5 + $0x640] sm:$0xff] }
  0xed   :  { %1828 = vmatpush1.bf16.msra.mxu0 %v1827_v49  ;;  %1574 = vmatprep.subr.bf16.mxu1 %v1573_v50  ;;  %v85_v49 = vld [vmem:[#allocation2 + $0xf8] sm:$0xff]  ;;  %v76_v50 = vld [vmem:[#allocation2 + $0xb0] sm:$0xff]  ;;  %v1595_v63 = vpack.c.bf16 %v292_v53, %v290_v48  ;;  %v566_v53 = vld [vmem:[#allocation5 + $0xee0] sm:$0xff] }
  0xee   :  { %1830 = vmatprep.subr.bf16.mxu0 %v1829_v54  ;;  %v546_v54 = vld [vmem:[#allocation5 + $0xe40] sm:$0xff] }
  0xef   :  { %v1851_v1 = vpack.c.bf16 %v548_v57, %v546_v54  ;;  %v317_v57 = vld [vmem:[#allocation5 + $0x718] sm:$0xff] }
  0xf0   :  { %1576 = vmatpush1.bf16.msra.mxu1 %v1575_v60  ;;  %v551_v60 = vld [vmem:[#allocation5 + $0xe68] sm:$0xff] }
  0xf1   :  { %1832 = vmatpush1.bf16.msra.mxu0 %v1831_v61  ;;  %1578 = vmatprep.subr.bf16.mxu1 %v1577_v62  ;;  %v553_v61 = vld [vmem:[#allocation5 + $0xe78] sm:$0xff] }
  0xf2   :  { %1834 = vmatprep.subr.bf16.mxu0 %v1833_v2  ;;  %v61_v62 = vld [vmem:[#allocation2 + $0x38] sm:$0xff]  ;;  %v1597_v2 = vpack.c.bf16 %v297_v59, %v295_v58  ;;  %v1853_v6 = vpack.c.bf16 %v553_v61, %v551_v60  ;;  %v571_v58 = vld [vmem:[#allocation5 + $0xf08] sm:$0xff] }
  0xf3   :  { %v573_v59 = vld [vmem:[#allocation5 + $0xf18] sm:$0xff] }
  0xf4   :  { %1580 = vmatpush1.bf16.msra.mxu1 %v1579_v8  ;;  %v299_v8 = vld [vmem:[#allocation5 + $0x688] sm:$0xff] }
  0xf5   :  { %1836 = vmatpush1.bf16.msra.mxu0 %v1835_v9  ;;  %1582 = vmatprep.subr.bf16.mxu1 %v1581_v10  ;;  %v301_v9 = vld [vmem:[#allocation5 + $0x698] sm:$0xff]  ;;  %v555_v10 = vld [vmem:[#allocation5 + $0xe88] sm:$0xff] }
  0xf6   :  { %1838 = vmatprep.subr.bf16.mxu0 %v1837_v14  ;;  %v1601_v14 = vpack.c.bf16 %v301_v9, %v299_v8  ;;  %v1857_v18 = vpack.c.bf16 %v557_v11, %v555_v10  ;;  %v1621_v10 = vpack.c.bf16 %v321_v5, %v319_v4  ;;  %v318_v11 = vld [vmem:[#allocation5 + $0x720] sm:$0xff] }
  0xf8   :  { %1584 = vmatpush1.bf16.msra.mxu1 %v1583_v20  ;;  %v303_v20 = vld [vmem:[#allocation5 + $0x6a8] sm:$0xff] }
  0xf9   :  { %1840 = vmatpush1.bf16.msra.mxu0 %v1839_v21  ;;  %1586 = vmatprep.subr.bf16.mxu1 %v1585_v22  ;;  %v305_v21 = vld [vmem:[#allocation5 + $0x6b8] sm:$0xff]  ;;  %v559_v22 = vld [vmem:[#allocation5 + $0xea8] sm:$0xff] }
  0xfa   :  { %1842 = vmatprep.subr.bf16.mxu0 %v1841_v26  ;;  %v1605_v26 = vpack.c.bf16 %v305_v21, %v303_v20  ;;  %v1861_v30 = vpack.c.bf16 %v561_v23, %v559_v22  ;;  %v1625_v22 = vpack.c.bf16 %v325_v17, %v323_v16  ;;  %v322_v23 = vld [vmem:[#allocation5 + $0x740] sm:$0xff] }
  0xfb   :  { %897 = vmatmul.mubr.f32.vlgmr.msra.gmra.mrb[0].mxu1 %v58_v32  ;;  %v307_v32 = vld [vmem:[#allocation5 + $0x6c8] sm:$0xff] }
  0xfc   :  { %1588 = vmatpush1.bf16.msra.mxu1 %v1587_v33  ;;  %1205 = vmatmul.mubr.f32.vlgmr.msra.gmra.mrb[0].mxu0 %v66_v34  ;;  %v309_v33 = vld [vmem:[#allocation5 + $0x6d8] sm:$0xff]  ;;  %v563_v34 = vld [vmem:[#allocation5 + $0xec8] sm:$0xff] }
  0xfd   :  { %1844 = vmatpush1.bf16.msra.mxu0 %v1843_v35  ;;  %1590 = vmatprep.subr.bf16.mxu1 %v1589_v36  ;;  %v565_v35 = vld [vmem:[#allocation5 + $0xed8] sm:$0xff]  ;;  %v1607_v36 = vpack.c.bf16 %v304_v28, %v302_v27  ;;  %v1609_v38 = vpack.c.bf16 %v309_v33, %v307_v32  ;;  %v580_v27 = vld [vmem:[#allocation5 + $0xf50] sm:$0xff]  ;;  %v327_v28 = vld [vmem:[#allocation5 + $0x768] sm:$0xff] }
  0xfe   :  { %1846 = vmatprep.subr.bf16.mxu0 %v1845_v40  ;;  %902 = vmatprep.mubr.f32.mxu1 %v77_v46  ;;  %v308_v40 = vld [vmem:[#allocation5 + $0x6d0] sm:$0xff]  ;;  %v1865_v42 = vpack.c.bf16 %v565_v35, %v563_v34  ;;  %v567_v46 = vld [vmem:[#allocation5 + $0xee8] sm:$0xff]  ;;  %v1629_v34 = vpack.c.bf16 %v329_v29, %v327_v28  ;;  %v326_v35 = vld [vmem:[#allocation5 + $0x760] sm:$0xff] }
  0xff   :  { %1210 = vmatprep.mubr.f32.mxu0 %v85_v49  ;;  %903 = vmatmul.mubr.f32.gmra.mrb[2].mxu1 %v76_v50  ;;  %v1611_v48 = vpack.c.bf16 %v308_v40, %v306_v39  ;;  %v1867_v49 = vpack.c.bf16 %v564_v43, %v562_v41  ;;  %v1613_v50 = vpack.c.bf16 %v313_v45, %v311_v44  ;;  %v584_v39 = vld [vmem:[#allocation5 + $0xf70] sm:$0xff]  ;;  %v331_v40 = vld [vmem:[#allocation5 + $0x788] sm:$0xff]  ;;  %v333_v41 = vld [vmem:[#allocation5 + $0x798] sm:$0xff] }
 0x100   :  { %1592 = vmatpush1.bf16.msra.mxu1 %v1591_v47  ;;  %1211 = vmatmul.mubr.f32.gmra.mrb[2].mxu0 %v84_v55  ;;  %v569_v47 = vld [vmem:[#allocation5 + $0xef8] sm:$0xff]  ;;  %v568_v55 = vld [vmem:[#allocation5 + $0xef0] sm:$0xff]  ;;  %v602_v29 = vld [vmem:[#allocation5 + $0x1000] sm:$0xff] }
 0x101   :  { %1848 = vmatpush1.bf16.msra.mxu0 %v1847_v51  ;;  %1594 = vmatprep.subr.bf16.mxu1 %v1593_v52  ;;  %v310_v51 = vld [vmem:[#allocation5 + $0x6e0] sm:$0xff]  ;;  %v312_v52 = vld [vmem:[#allocation5 + $0x6f0] sm:$0xff]  ;;  %v1869_v54 = vpack.c.bf16 %v569_v47, %v567_v46  ;;  %v1871_v61 = vpack.c.bf16 %v568_v55, %v566_v53  ;;  %v589_v43 = vld [vmem:[#allocation5 + $0xf98] sm:$0xff]  ;;  %v1633_v46 = vpack.c.bf16 %v333_v41, %v331_v40 }
 0x102   :  { %1850 = vmatprep.subr.bf16.mxu0 %v1849_v56  ;;  %973 = vmatprep.mubr.f32.mxu1 %v61_v62  ;;  %v315_v56 = vld [vmem:[#allocation5 + $0x708] sm:$0xff]  ;;  %v1615_v60 = vpack.c.bf16 %v312_v52, %v310_v51  ;;  %v330_v47 = vld [vmem:[#allocation5 + $0x780] sm:$0xff]  ;;  %v588_v51 = vld [vmem:[#allocation5 + $0xf90] sm:$0xff] }
 0x103   :  { %1281 = vmatprep.mubr.f32.mxu0 %v69_v0  ;;  %v1617_v62 = vpack.c.bf16 %v317_v57, %v315_v56  ;;  %v316_v0 = vld [vmem:[#allocation5 + $0x710] sm:$0xff]  ;;  %v335_v52 = vld [vmem:[#allocation5 + $0x7a8] sm:$0xff]  ;;  %v337_v53 = vld [vmem:[#allocation5 + $0x7b8] sm:$0xff] }
 0x104   :  { %1596 = vmatpush1.bf16.msra.mxu1 %v1595_v63  ;;  %v314_v63 = vld [vmem:[#allocation5 + $0x700] sm:$0xff]  ;;  %v593_v55 = vld [vmem:[#allocation5 + $0xfb8] sm:$0xff]  ;;  %v611_v40 = vld [vmem:[#allocation5 + $0x1048] sm:$0xff] }
 0x105   :  { %1852 = vmatpush1.bf16.msra.mxu0 %v1851_v1  ;;  %1598 = vmatprep.subr.bf16.mxu1 %v1597_v2  ;;  %v570_v1 = vld [vmem:[#allocation5 + $0xf00] sm:$0xff]  ;;  %v1873_v2 = vpack.c.bf16 %v573_v59, %v571_v58  ;;  %v1619_v8 = vpack.c.bf16 %v316_v0, %v314_v63  ;;  %v1637_v58 = vpack.c.bf16 %v337_v53, %v335_v52  ;;  %v592_v63 = vld [vmem:[#allocation5 + $0xfb0] sm:$0xff]  ;;  %v339_v0 = vld [vmem:[#allocation5 + $0x7c8] sm:$0xff] }
 0x106   :  { %1854 = vmatprep.subr.bf16.mxu0 %v1853_v6  ;;  %v575_v6 = vld [vmem:[#allocation5 + $0xf28] sm:$0xff]  ;;  %v1875_v9 = vpack.c.bf16 %v572_v3, %v570_v1  ;;  %v334_v59 = vld [vmem:[#allocation5 + $0x7a0] sm:$0xff]  ;;  %v341_v1 = vld [vmem:[#allocation5 + $0x7d8] sm:$0xff] }
 0x107   :  { %v597_v3 = vld [vmem:[#allocation5 + $0xfd8] sm:$0xff] }
 0x108   :  { %1600 = vmatpush1.bf16.msra.mxu1 %v1599_v12  ;;  %v320_v12 = vld [vmem:[#allocation5 + $0x730] sm:$0xff]  ;;  %v613_v41 = vld [vmem:[#allocation5 + $0x1058] sm:$0xff] }
 0x109   :  { %1856 = vmatpush1.bf16.msra.mxu0 %v1855_v13  ;;  %1602 = vmatprep.subr.bf16.mxu1 %v1601_v14  ;;  %v574_v13 = vld [vmem:[#allocation5 + $0xf20] sm:$0xff]  ;;  %v1877_v14 = vpack.c.bf16 %v577_v7, %v575_v6  ;;  %v1623_v20 = vpack.c.bf16 %v320_v12, %v318_v11  ;;  %v1641_v6 = vpack.c.bf16 %v341_v1, %v339_v0  ;;  %v596_v11 = vld [vmem:[#allocation5 + $0xfd0] sm:$0xff]  ;;  %v343_v12 = vld [vmem:[#allocation5 + $0x7e8] sm:$0xff] }
 0x10a   :  { %1858 = vmatprep.subr.bf16.mxu0 %v1857_v18  ;;  %v579_v18 = vld [vmem:[#allocation5 + $0xf48] sm:$0xff]  ;;  %v1879_v21 = vpack.c.bf16 %v576_v15, %v574_v13  ;;  %v338_v7 = vld [vmem:[#allocation5 + $0x7c0] sm:$0xff]  ;;  %v345_v13 = vld [vmem:[#allocation5 + $0x7f8] sm:$0xff] }
 0x10b   :  { %v601_v15 = vld [vmem:[#allocation5 + $0xff8] sm:$0xff] }
 0x10c   :  { %1604 = vmatpush1.bf16.msra.mxu1 %v1603_v24  ;;  %v324_v24 = vld [vmem:[#allocation5 + $0x750] sm:$0xff]  ;;  %v89_v53 = vld [vmem:[#allocation2 + $0x118] sm:$0xff] }
 0x10d   :  { %1860 = vmatpush1.bf16.msra.mxu0 %v1859_v25  ;;  %1606 = vmatprep.subr.bf16.mxu1 %v1605_v26  ;;  %v578_v25 = vld [vmem:[#allocation5 + $0xf40] sm:$0xff]  ;;  %v1881_v26 = vpack.c.bf16 %v581_v19, %v579_v18  ;;  %v1627_v32 = vpack.c.bf16 %v324_v24, %v322_v23  ;;  %v1645_v18 = vpack.c.bf16 %v345_v13, %v343_v12  ;;  %v600_v23 = vld [vmem:[#allocation5 + $0xff0] sm:$0xff]  ;;  %v603_v24 = vld [vmem:[#allocation5 + $0x1008] sm:$0xff] }
 0x10e   :  { %1862 = vmatprep.subr.bf16.mxu0 %v1861_v30  ;;  %v583_v30 = vld [vmem:[#allocation5 + $0xf68] sm:$0xff]  ;;  %v1883_v33 = vpack.c.bf16 %v580_v27, %v578_v25  ;;  %v342_v19 = vld [vmem:[#allocation5 + $0x7e0] sm:$0xff]  ;;  %v605_v25 = vld [vmem:[#allocation5 + $0x1018] sm:$0xff] }
 0x10f   :  { %v1905_v28 = vpack.c.bf16 %v605_v25, %v603_v24  ;;  %v625_v0 = vld [vmem:[#allocation5 + $0x10b8] sm:$0xff] }
 0x110   :  { %1608 = vmatpush1.bf16.msra.mxu1 %v1607_v36  ;;  %v328_v36 = vld [vmem:[#allocation5 + $0x770] sm:$0xff]  ;;  %v633_v12 = vld [vmem:[#allocation5 + $0x10f8] sm:$0xff] }
 0x111   :  { %1864 = vmatpush1.bf16.msra.mxu0 %v1863_v37  ;;  %1610 = vmatprep.subr.bf16.mxu1 %v1609_v38  ;;  %v582_v37 = vld [vmem:[#allocation5 + $0xf60] sm:$0xff]  ;;  %v1885_v38 = vpack.c.bf16 %v585_v31, %v583_v30  ;;  %v1631_v44 = vpack.c.bf16 %v328_v36, %v326_v35  ;;  %v604_v30 = vld [vmem:[#allocation5 + $0x1010] sm:$0xff]  ;;  %v607_v31 = vld [vmem:[#allocation5 + $0x1028] sm:$0xff] }
 0x112   :  { %1866 = vmatprep.subr.bf16.mxu0 %v1865_v42  ;;  %v587_v42 = vld [vmem:[#allocation5 + $0xf88] sm:$0xff]  ;;  %v1887_v45 = vpack.c.bf16 %v584_v39, %v582_v37  ;;  %v68_v35 = vld [vmem:[#allocation2 + $0x70] sm:$0xff]  ;;  %v606_v36 = vld [vmem:[#allocation5 + $0x1020] sm:$0xff] }
 0x113   :  { %v608_v37 = vld [vmem:[#allocation5 + $0x1030] sm:$0xff]  ;;  %v641_v24 = vld [vmem:[#allocation5 + $0x1138] sm:$0xff] }
 0x114   :  { %1612 = vmatpush1.bf16.msra.mxu1 %v1611_v48  ;;  %v332_v48 = vld [vmem:[#allocation5 + $0x790] sm:$0xff] }
 0x115   :  { %1868 = vmatpush1.bf16.msra.mxu0 %v1867_v49  ;;  %1614 = vmatprep.subr.bf16.mxu1 %v1613_v50  ;;  %v586_v49 = vld [vmem:[#allocation5 + $0xf80] sm:$0xff]  ;;  %v1889_v50 = vpack.c.bf16 %v589_v43, %v587_v42  ;;  %v1635_v56 = vpack.c.bf16 %v332_v48, %v330_v47  ;;  %v87_v42 = vld [vmem:[#allocation2 + $0x108] sm:$0xff]  ;;  %v612_v48 = vld [vmem:[#allocation5 + $0x1050] sm:$0xff] }
 0x116   :  { %1870 = vmatprep.subr.bf16.mxu0 %v1869_v54  ;;  %v591_v54 = vld [vmem:[#allocation5 + $0xfa8] sm:$0xff]  ;;  %v1891_v57 = vpack.c.bf16 %v588_v51, %v586_v49  ;;  %v78_v43 = vld [vmem:[#allocation2 + $0xc0] sm:$0xff] }
 0x117   :  { %v610_v47 = vld [vmem:[#allocation5 + $0x1040] sm:$0xff]  ;;  %v615_v49 = vld [vmem:[#allocation5 + $0x1068] sm:$0xff] }
 0x118   :  { %1616 = vmatpush1.bf16.msra.mxu1 %v1615_v60  ;;  %v336_v60 = vld [vmem:[#allocation5 + $0x7b0] sm:$0xff]  ;;  %v71_v51 = vld [vmem:[#allocation2 + $0x88] sm:$0xff]  ;;  %v1915_v52 = vpack.c.bf16 %v612_v48, %v610_v47  ;;  %v657_v48 = vld [vmem:[#allocation5 + $0x11b8] sm:$0xff] }
 0x119   :  { %1872 = vmatpush1.bf16.msra.mxu0 %v1871_v61  ;;  %1618 = vmatprep.subr.bf16.mxu1 %v1617_v62  ;;  %v590_v61 = vld [vmem:[#allocation5 + $0xfa0] sm:$0xff]  ;;  %v1893_v62 = vpack.c.bf16 %v593_v55, %v591_v54  ;;  %v1639_v4 = vpack.c.bf16 %v336_v60, %v334_v59  ;;  %v655_v47 = vld [vmem:[#allocation5 + $0x11a8] sm:$0xff] }
 0x11a   :  { %1874 = vmatprep.subr.bf16.mxu0 %v1873_v2  ;;  %v595_v2 = vld [vmem:[#allocation5 + $0xfc8] sm:$0xff]  ;;  %v1895_v5 = vpack.c.bf16 %v592_v63, %v590_v61  ;;  %v614_v55 = vld [vmem:[#allocation5 + $0x1060] sm:$0xff] }
 0x11b   :  { %v618_v61 = vld [vmem:[#allocation5 + $0x1080] sm:$0xff]  ;;  %v623_v63 = vld [vmem:[#allocation5 + $0x10a8] sm:$0xff] }
 0x11c   :  { %1620 = vmatpush1.bf16.msra.mxu1 %v1619_v8  ;;  %v340_v8 = vld [vmem:[#allocation5 + $0x7d0] sm:$0xff] }
 0x11d   :  { %1876 = vmatpush1.bf16.msra.mxu0 %v1875_v9  ;;  %1622 = vmatprep.subr.bf16.mxu1 %v1621_v10  ;;  %v594_v9 = vld [vmem:[#allocation5 + $0xfc0] sm:$0xff]  ;;  %v1897_v10 = vpack.c.bf16 %v597_v3, %v595_v2  ;;  %v1643_v16 = vpack.c.bf16 %v340_v8, %v338_v7  ;;  %v1925_v2 = vpack.c.bf16 %v625_v0, %v623_v63  ;;  %v664_v0 = vld [vmem:[#allocation5 + $0x11f0] sm:$0xff] }
 0x11e   :  { %1878 = vmatprep.subr.bf16.mxu0 %v1877_v14  ;;  %v599_v14 = vld [vmem:[#allocation5 + $0xfe8] sm:$0xff]  ;;  %v1899_v17 = vpack.c.bf16 %v596_v11, %v594_v9  ;;  %v622_v3 = vld [vmem:[#allocation5 + $0x10a0] sm:$0xff] }
 0x11f   :  { %v626_v9 = vld [vmem:[#allocation5 + $0x10c0] sm:$0xff]  ;;  %v631_v11 = vld [vmem:[#allocation5 + $0x10e8] sm:$0xff] }
 0x120   :  { %1624 = vmatpush1.bf16.msra.mxu1 %v1623_v20  ;;  %v344_v20 = vld [vmem:[#allocation5 + $0x7f0] sm:$0xff]  ;;  %v662_v63 = vld [vmem:[#allocation5 + $0x11e0] sm:$0xff] }
 0x121   :  { %1880 = vmatpush1.bf16.msra.mxu0 %v1879_v21  ;;  %1626 = vmatprep.subr.bf16.mxu1 %v1625_v22  ;;  %v598_v21 = vld [vmem:[#allocation5 + $0xfe0] sm:$0xff]  ;;  %v1901_v22 = vpack.c.bf16 %v601_v15, %v599_v14  ;;  %v1933_v14 = vpack.c.bf16 %v633_v12, %v631_v11 }
 0x122   :  { %1882 = vmatprep.subr.bf16.mxu0 %v1881_v26  ;;  %v1647_v26 = vpack.c.bf16 %v344_v20, %v342_v19  ;;  %v1903_v27 = vpack.c.bf16 %v600_v23, %v598_v21  ;;  %v630_v15 = vld [vmem:[#allocation5 + $0x10e0] sm:$0xff]  ;;  %v639_v23 = vld [vmem:[#allocation5 + $0x1128] sm:$0xff] }
 0x123   :  { %v634_v21 = vld [vmem:[#allocation5 + $0x1100] sm:$0xff] }
 0x124   :  { %1628 = vmatpush1.bf16.msra.mxu1 %v1627_v32  ;;  %v609_v32 = vld [vmem:[#allocation5 + $0x1038] sm:$0xff] }
 0x125   :  { %1884 = vmatpush1.bf16.msra.mxu0 %v1883_v33  ;;  %1630 = vmatprep.subr.bf16.mxu1 %v1629_v34  ;;  %v60_v33 = vld [vmem:[#allocation2 + $0x30] sm:$0xff]  ;;  %v1907_v34 = vpack.c.bf16 %v604_v30, %v602_v29  ;;  %v1909_v39 = vpack.c.bf16 %v609_v32, %v607_v31  ;;  %v643_v29 = vld [vmem:[#allocation5 + $0x1148] sm:$0xff]  ;;  %v645_v30 = vld [vmem:[#allocation5 + $0x1158] sm:$0xff] }
 0x126   :  { %1886 = vmatprep.subr.bf16.mxu0 %v1885_v38  ;;  %v79_v38 = vld [vmem:[#allocation2 + $0xc8] sm:$0xff]  ;;  %v1945_v32 = vpack.c.bf16 %v645_v30, %v643_v29 }
 0x128   :  { %1632 = vmatpush1.bf16.msra.mxu1 %v1631_v44  ;;  %v1911_v44 = vpack.c.bf16 %v608_v37, %v606_v36  ;;  %v649_v36 = vld [vmem:[#allocation5 + $0x1178] sm:$0xff] }
 0x129   :  { %1888 = vmatpush1.bf16.msra.mxu0 %v1887_v45  ;;  %1634 = vmatprep.subr.bf16.mxu1 %v1633_v46  ;;  %v86_v45 = vld [vmem:[#allocation2 + $0x100] sm:$0xff]  ;;  %v1913_v46 = vpack.c.bf16 %v613_v41, %v611_v40  ;;  %v648_v40 = vld [vmem:[#allocation5 + $0x1170] sm:$0xff]  ;;  %v651_v41 = vld [vmem:[#allocation5 + $0x1188] sm:$0xff] }
 0x12a   :  { %1890 = vmatprep.subr.bf16.mxu0 %v1889_v50  ;;  %v617_v50 = vld [vmem:[#allocation5 + $0x1078] sm:$0xff] }
 0x12b   :  { %v1917_v54 = vpack.c.bf16 %v617_v50, %v615_v49  ;;  %v1957_v50 = vpack.c.bf16 %v657_v48, %v655_v47 }
 0x12c   :  { %1636 = vmatpush1.bf16.msra.mxu1 %v1635_v56  ;;  %v616_v56 = vld [vmem:[#allocation5 + $0x1070] sm:$0xff] }
 0x12d   :  { %1892 = vmatpush1.bf16.msra.mxu0 %v1891_v57  ;;  %1638 = vmatprep.subr.bf16.mxu1 %v1637_v58  ;;  %v619_v57 = vld [vmem:[#allocation5 + $0x1088] sm:$0xff]  ;;  %v621_v58 = vld [vmem:[#allocation5 + $0x1098] sm:$0xff]  ;;  %v1919_v59 = vpack.c.bf16 %v616_v56, %v614_v55 }
 0x12e   :  { %1894 = vmatprep.subr.bf16.mxu0 %v1893_v62  ;;  %v1921_v60 = vpack.c.bf16 %v621_v58, %v619_v57  ;;  %v620_v62 = vld [vmem:[#allocation5 + $0x1090] sm:$0xff]  ;;  %v658_v57 = vld [vmem:[#allocation5 + $0x11c0] sm:$0xff] }
 0x12f   :  { %v1923_v1 = vpack.c.bf16 %v620_v62, %v618_v61  ;;  %v660_v58 = vld [vmem:[#allocation5 + $0x11d0] sm:$0xff] }
 0x130   :  { %1640 = vmatpush1.bf16.msra.mxu1 %v1639_v4  ;;  %v624_v4 = vld [vmem:[#allocation5 + $0x10b0] sm:$0xff]  ;;  %v1963_v61 = vpack.c.bf16 %v660_v58, %v658_v57 }
 0x131   :  { %1896 = vmatpush1.bf16.msra.mxu0 %v1895_v5  ;;  %1642 = vmatprep.subr.bf16.mxu1 %v1641_v6  ;;  %v627_v5 = vld [vmem:[#allocation5 + $0x10c8] sm:$0xff]  ;;  %v629_v6 = vld [vmem:[#allocation5 + $0x10d8] sm:$0xff]  ;;  %v1927_v7 = vpack.c.bf16 %v624_v4, %v622_v3  ;;  %v70_v3 = vld [vmem:[#allocation2 + $0x80] sm:$0xff]  ;;  %v668_v4 = vlaneseq }
 0x132   :  { %1898 = vmatprep.subr.bf16.mxu0 %v1897_v10  ;;  %v1929_v8 = vpack.c.bf16 %v629_v6, %v627_v5  ;;  %v628_v10 = vld [vmem:[#allocation5 + $0x10d0] sm:$0xff] }
 0x133   :  { %v1931_v13 = vpack.c.bf16 %v628_v10, %v626_v9  ;;  %v669_v5 = vshrl.u32 %v668_v4, 7 }
 0x134   :  { %1644 = vmatpush1.bf16.msra.mxu1 %v1643_v16  ;;  %v632_v16 = vld [vmem:[#allocation5 + $0x10f0] sm:$0xff] }
 0x135   :  { %1900 = vmatpush1.bf16.msra.mxu0 %v1899_v17  ;;  %1646 = vmatprep.subr.bf16.mxu1 %v1645_v18  ;;  %v635_v17 = vld [vmem:[#allocation5 + $0x1108] sm:$0xff]  ;;  %v637_v18 = vld [vmem:[#allocation5 + $0x1118] sm:$0xff]  ;;  %v1935_v19 = vpack.c.bf16 %v632_v16, %v630_v15  ;;  %v670_v6 = vsub.s32 0, %v669_v5  ;;  %v674_v9 = vsub.s32 1, %v669_v5 }
 0x136   :  { %1902 = vmatprep.subr.bf16.mxu0 %v1901_v22  ;;  %v1937_v20 = vpack.c.bf16 %v637_v18, %v635_v17  ;;  %v636_v22 = vld [vmem:[#allocation5 + $0x1110] sm:$0xff] }
 0x137   :  { %v1939_v25 = vpack.c.bf16 %v636_v22, %v634_v21 }
 0x138   :  { %1648 = vmatpush1.bf16.msra.mxu1 %v1647_v26  ;;  %v1941_v26 = vpack.c.bf16 %v641_v24, %v639_v23 }
 0x139   :  { %1904 = vmatpush1.bf16.msra.mxu0 %v1903_v27  ;;  %1969 = vmatprep.subr.bf16.mxu1 %v1905_v28  ;;  %v638_v27 = vld [vmem:[#allocation5 + $0x1120] sm:$0xff] }
 0x13a   :  { %1906 = vmatprep.subr.bf16.mxu0 %v1905_v28  ;;  %v640_v28 = vld [vmem:[#allocation5 + $0x1130] sm:$0xff] }
 0x13b   :  { %974 = vmatmul.mubr.f32.vlgmr.msra.gmra.mrb[0].mxu1 %v60_v33  ;;  %v1943_v31 = vpack.c.bf16 %v640_v28, %v638_v27  ;;  %v642_v33 = vld [vmem:[#allocation5 + $0x1140] sm:$0xff] }
 0x13c   :  { %1282 = vmatmul.mubr.f32.vlgmr.msra.gmra.mrb[0].mxu0 %v68_v35  ;;  %1985 = vmatpush1.bf16.msra.mxu1 %v1907_v34  ;;  %v647_v35 = vld [vmem:[#allocation5 + $0x1168] sm:$0xff] }
 0x13d   :  { %1908 = vmatpush1.bf16.msra.mxu0 %v1907_v34  ;;  %979 = vmatprep.mubr.f32.mxu1 %v79_v38  ;;  %v644_v34 = vld [vmem:[#allocation5 + $0x1150] sm:$0xff]  ;;  %v1949_v38 = vpack.c.bf16 %v649_v36, %v647_v35 }
 0x13e   :  { %1287 = vmatprep.mubr.f32.mxu0 %v87_v42  ;;  %1910 = vmatprep.subr.bf16.mxu0 %v1909_v39  ;;  %v1947_v37 = vpack.c.bf16 %v644_v34, %v642_v33  ;;  %v653_v42 = vld [vmem:[#allocation5 + $0x1198] sm:$0xff] }
 0x13f   :  { %980 = vmatmul.mubr.f32.gmra.mrb[2].mxu1 %v78_v43  ;;  %1970 = vmatprep.subr.bf16.mxu1 %v1909_v39  ;;  %v646_v39 = vld [vmem:[#allocation5 + $0x1160] sm:$0xff] }
 0x140   :  { %1288 = vmatmul.mubr.f32.gmra.mrb[2].mxu0 %v86_v45  ;;  %1986 = vmatpush1.bf16.msra.mxu1 %v1911_v44  ;;  %v1951_v43 = vpack.c.bf16 %v648_v40, %v646_v39  ;;  %v650_v45 = vld [vmem:[#allocation5 + $0x1180] sm:$0xff] }
 0x141   :  { %1912 = vmatpush1.bf16.msra.mxu0 %v1911_v44  ;;  %1971 = vmatprep.subr.bf16.mxu1 %v1913_v46  ;;  %v1953_v44 = vpack.c.bf16 %v653_v42, %v651_v41 }
 0x142   :  { %1914 = vmatprep.subr.bf16.mxu0 %v1913_v46  ;;  %1358 = vmatprep.mubr.f32.mxu0 %v71_v51  ;;  %v652_v46 = vld [vmem:[#allocation5 + $0x1190] sm:$0xff]  ;;  %v654_v51 = vld [vmem:[#allocation5 + $0x11a0] sm:$0xff] }
 0x143   :  { %1364 = vmatprep.mubr.f32.mxu1 %v89_v53  ;;  %v1955_v49 = vpack.c.bf16 %v652_v46, %v650_v45  ;;  %v659_v53 = vld [vmem:[#allocation5 + $0x11c8] sm:$0xff] }
 0x144   :  { %1987 = vmatpush1.bf16.msra.mxu1 %v1915_v52 }
 0x145   :  { %1916 = vmatpush1.bf16.msra.mxu0 %v1915_v52  ;;  %1972 = vmatprep.subr.bf16.mxu1 %v1917_v54  ;;  %v656_v52 = vld [vmem:[#allocation5 + $0x11b0] sm:$0xff] }
 0x146   :  { %1918 = vmatprep.subr.bf16.mxu0 %v1917_v54  ;;  %v661_v54 = vld [vmem:[#allocation5 + $0x11d8] sm:$0xff]  ;;  %v1959_v55 = vpack.c.bf16 %v656_v52, %v654_v51 }
 0x147   :  { %v1961_v56 = vpack.c.bf16 %v661_v54, %v659_v53 }
 0x148   :  { %1988 = vmatpush1.bf16.msra.mxu1 %v1919_v59 }
 0x149   :  { %1920 = vmatpush1.bf16.msra.mxu0 %v1919_v59  ;;  %1973 = vmatprep.subr.bf16.mxu1 %v1921_v60  ;;  %v663_v59 = vld [vmem:[#allocation5 + $0x11e8] sm:$0xff] }
 0x14a   :  { %1922 = vmatprep.subr.bf16.mxu0 %v1921_v60  ;;  %v665_v60 = vld [vmem:[#allocation5 + $0x11f8] sm:$0xff] }
 0x14b   :  { %v1965_v62 = vpack.c.bf16 %v665_v60, %v663_v59 }
 0x14c   :  { %1989 = vmatpush1.bf16.msra.mxu1 %v1923_v1 }
 0x14d   :  { %1924 = vmatpush1.bf16.msra.mxu0 %v1923_v1  ;;  %1974 = vmatprep.subr.bf16.mxu1 %v1925_v2  ;;  %v1967_v1 = vpack.c.bf16 %v664_v0, %v662_v63 }
 0x14e   :  { %1926 = vmatprep.subr.bf16.mxu0 %v1925_v2  ;;  %v88_v2 = vld [vmem:[#allocation2 + $0x110] sm:$0xff] }
 0x150   :  { %1990 = vmatpush1.bf16.msra.mxu1 %v1927_v7 }
 0x151   :  { %1928 = vmatpush1.bf16.msra.mxu0 %v1927_v7  ;;  %1975 = vmatprep.subr.bf16.mxu1 %v1929_v8  ;;  %v666_v7 = vld [vmem:[#allocation7] sm:$0x3] }
 0x152   :  { %1930 = vmatprep.subr.bf16.mxu0 %v1929_v8  ;;  %v671_v11 = vrot.slane %v666_v7, %v670_v6  ;;  %v675_v12 = vrot.slane %v666_v7, %v674_v9 }
 0x154   :  { %1991 = vmatpush1.bf16.msra.mxu1 %v1931_v13 }
 0x155   :  { %1932 = vmatpush1.bf16.msra.mxu0 %v1931_v13  ;;  %1976 = vmatprep.subr.bf16.mxu1 %v1933_v14 }
 0x156   :  { %1934 = vmatprep.subr.bf16.mxu0 %v1933_v14 }
 0x158   :  { %1992 = vmatpush1.bf16.msra.mxu1 %v1935_v19 }
 0x159   :  { %1936 = vmatpush1.bf16.msra.mxu0 %v1935_v19  ;;  %1977 = vmatprep.subr.bf16.mxu1 %v1937_v20 }
 0x15a   :  { %1938 = vmatprep.subr.bf16.mxu0 %v1937_v20 }
 0x15c   :  { %1993 = vmatpush1.bf16.msra.mxu1 %v1939_v25 }
 0x15d   :  { %1940 = vmatpush1.bf16.msra.mxu0 %v1939_v25  ;;  %1978 = vmatprep.subr.bf16.mxu1 %v1941_v26 }
 0x15e   :  { %1942 = vmatprep.subr.bf16.mxu0 %v1941_v26 }
 0x160   :  { %1994 = vmatpush1.bf16.msra.mxu1 %v1943_v31 }
 0x161   :  { %1944 = vmatpush1.bf16.msra.mxu0 %v1943_v31  ;;  %1979 = vmatprep.subr.bf16.mxu1 %v1945_v32 }
 0x162   :  { %1946 = vmatprep.subr.bf16.mxu0 %v1945_v32 }
 0x164   :  { %1995 = vmatpush1.bf16.msra.mxu1 %v1947_v37 }
 0x165   :  { %1948 = vmatpush1.bf16.msra.mxu0 %v1947_v37  ;;  %1980 = vmatprep.subr.bf16.mxu1 %v1949_v38 }
 0x166   :  { %1950 = vmatprep.subr.bf16.mxu0 %v1949_v38 }
 0x168   :  { %1996 = vmatpush1.bf16.msra.mxu1 %v1951_v43 }
 0x169   :  { %1952 = vmatpush1.bf16.msra.mxu0 %v1951_v43  ;;  %1981 = vmatprep.subr.bf16.mxu1 %v1953_v44 }
 0x16a   :  { %1954 = vmatprep.subr.bf16.mxu0 %v1953_v44 }
 0x16c   :  { %1997 = vmatpush1.bf16.msra.mxu1 %v1955_v49 }
 0x16d   :  { %1956 = vmatpush1.bf16.msra.mxu0 %v1955_v49  ;;  %1982 = vmatprep.subr.bf16.mxu1 %v1957_v50 }
 0x16e   :  { %1958 = vmatprep.subr.bf16.mxu0 %v1957_v50 }
 0x170   :  { %1998 = vmatpush1.bf16.msra.mxu1 %v1959_v55 }
 0x171   :  { %1960 = vmatpush1.bf16.msra.mxu0 %v1959_v55  ;;  %1983 = vmatprep.subr.bf16.mxu1 %v1961_v56 }
 0x172   :  { %1962 = vmatprep.subr.bf16.mxu0 %v1961_v56 }
 0x174   :  { %1999 = vmatpush1.bf16.msra.mxu1 %v1963_v61 }
 0x175   :  { %1964 = vmatpush1.bf16.msra.mxu0 %v1963_v61  ;;  %1984 = vmatprep.subr.bf16.mxu1 %v1965_v62 }
 0x176   :  { %1966 = vmatprep.subr.bf16.mxu0 %v1965_v62 }
 0x178   :  { %2000 = vmatpush1.bf16.msra.mxu1 %v1967_v1 }
 0x179   :  { %1968 = vmatpush1.bf16.msra.mxu0 %v1967_v1 }
 0x17b   :  { %1365 = vmatmul.mubr.f32.vlgmr.msra.gmra.mrb[4].mxu1 %v88_v2 }
 0x17c   :  { %1359 = vmatmul.mubr.f32.vlgmr.msra.gmra.mrb[0].mxu0 %v70_v3 }
 0x20e   :  { %v975_v8 = vpop.f32.mrb[0].mxu1 }
 0x20f   :  { %v977_v10 = vpop.f32.mrb[1].mxu1  ;;  %v2001_v21 = vadd.f32 %v975_v8, %v671_v11 }
 0x210   :  { %v2003_v23 = vadd.f32 %v977_v10, %v675_v12 }
 0x212   :  { %v981_v13 = vpop.f32.mrb[2].mxu1 }
 0x213   :  { %v2005_v14 = vadd.f32 %v981_v13, %v671_v11  ;;  %v1289_v15 = vpop.f32.mrb[2].mxu0  ;;  %v983_v16 = vpop.f32.mrb[3].mxu1 }
 0x214   :  { %v2008_v17 = vadd.f32 %v983_v16, %v675_v12  ;;  %v1291_v18 = vpop.f32.mrb[3].mxu0 }
 0x215   :  { %v2006_v19 = vadd.f32 %v2005_v14, %v1289_v15 }
 0x216   :  { %v2009_v20 = vadd.f32 %v2008_v17, %v1291_v18 }
 0x24e   :  { %v1366_v22 = vpop.f32.mrb[4].mxu1 }
 0x24f   :  { %v1360_v24 = vpop.f32.mrb[0].mxu0  ;;  %v2007_v25 = vadd.f32 %v2006_v19, %v1366_v22  ;;  %v1368_v26 = vpop.f32.mrb[5].mxu1 }
 0x250   :  { %v2002_v27 = vadd.f32 %v2001_v21, %v1360_v24  ;;  %v1362_v28 = vpop.f32.mrb[1].mxu0  ;;  %v2010_v29 = vadd.f32 %v2009_v20, %v1368_v26 }
 0x251   :  { %1373 = vst [vmem:[#allocation8 + $0x10] sm:$0xff] %v2007_v25  ;;  %v2004_v30 = vadd.f32 %v2003_v23, %v1362_v28 }
 0x252   :  { %1371 = vst [vmem:[#allocation8] sm:$0xff] %v2002_v27  ;;  %1374 = vst [vmem:[#allocation8 + $0x18] sm:$0xff] %v2010_v29 }
 0x253   :  { %1372 = vst [vmem:[#allocation8 + $0x8] sm:$0xff] %v2004_v30 }
 0x254   :  { %2122 = shalt.err (!%p2119_p0)
}
 0x255   :  { %s2123_s29 = scalar_lea.hbm %s2224_s3, 512 }
 0x256   :  { %p2124_p1 = scmp.ne.s32.totalorder %s2224_s3, %s2123_s29  ;;  %p2127_p2 = scmp.lt.u32.totalorder %s2123_s29, %s2224_s3 }
 0x258   :  { %p2129_p3 = pnand %p2127_p2, %p2124_p1 }
 0x25a   :  { %2132 = shalt.err (!%p2129_p3)
}
 0x25b   :  { %1386 = dma.vmem_to_hbm [thread:$0]  %s1381_s25, 512, %s2224_s3, [#allocation4], %s2140_s22, %s2140_s22, %s2141_s23  }
 0x25c   :  { %2137 = dma.done.wait [#allocation4], 512  }
 0x25d   :  { %2138 = vsyncadd [#allocation4], 4294966784 }
 0x25e   :  { %1390 = vsyncpa [#allocation3], 1 }
 0x25f   :  { %1391 = vsyncpa [#allocation6], 1 }
 0x260   :  { %1392 = vsyncpa [#allocation4], 1 }

</bundles_post_ra>
